<compile_context>
chip_gen: v5e
topology: v5e:2x2
jax: 0.10.0
libtpu: 0.0.40
codegen_flags: <defaults>
</compile_context>

<pallas_src>
import functools

import jax
import jax.numpy as jnp
import numpy as np
from jax.experimental import pallas as pl
from jax.experimental.pallas import tpu as pltpu

N_BITS = 8  # UniformAffineQuantizer default


# ----------------------------- Pallas kernel -------------------------------

def _fused_conv_kernel(q_ref, x_ref, w_ref, b_ref, o_ref, col_ref, *,
                       kh, kw, Wp, lout, cin, n_levels,
                       use_weight_quant, apply_act_quant, mxu_dtype):
    """One (batch, row-block) step: micro-im2col -> single MXU matmul -> bias -> act fake-quant.

    q_ref   : SMEM (6,) = [w_delta, w_zp, 1/w_delta, a_delta, a_zp, 1/a_delta]
    x_ref   : (1, 1, win_len, Cin)  halo'd row window of the zero-padded NHWC image, spatially
                                    flattened; win_len = (row_block + kh - 1)*Wp + kw - 1
    w_ref   : (K, Cpad)             weight as (ky,kx,cin)-major matrix, Cout padded to Cpad
    b_ref   : (1, Cpad)             bias (f32)
    o_ref   : (1, lout, Cpad)       lane-dense output tile, lout = row_block*Wp
    col_ref : VMEM (lout, K)        f32 micro-im2col scratch, K = kh*kw*Cin
    """
    # Hoisted SMEM scalar reads (once per grid step, not per tap).
    w_delta, w_zp, w_inv = q_ref[0], q_ref[1], q_ref[2]
    a_delta, a_zp, a_inv = q_ref[3], q_ref[4], q_ref[5]
    q_max = float(n_levels - 1)

    # ---- weight fake-quant hoisted out of the tap loop: one pass over the (K, Cpad) matrix ----
    # (Re-done per grid step instead of pl.when(first step) so it stays correct when the
    #  "parallel" grid axes are sharded across v7x TensorCores; it is a tiny VPU pass.)
    w = w_ref[...].astype(jnp.float32)
    if use_weight_quant:
        w_q = jnp.clip(jnp.round(w * w_inv) + w_zp, 0.0, q_max)
        w = (w_q - w_zp) * w_delta
    w = w.astype(mxu_dtype)

    # ---- micro-im2col: taps become extra contraction depth instead of extra matmuls ----
    # Single full-offset load of the window (then an f32 upcast), so the per-tap shifted views are
    # plain f32 relayouts regardless of the HBM input dtype.
    xwin = x_ref[0, 0].astype(jnp.float32)                       # (win_len, Cin)
    for ky in range(kh):
        base = ky * Wp
        for kx in range(kw):
            t = ky * kw + kx
            col_ref[:, t * cin:(t + 1) * cin] = xwin[base + kx: base + kx + lout, :]

    # ---- one MXU contraction with K = kh*kw*Cin, f32 accumulation ----
    acc = jnp.dot(col_ref[...].astype(mxu_dtype), w, preferred_element_type=jnp.float32)
    acc = acc + b_ref[...]                                        # (1, Cpad) broadcast

    if apply_act_quant:                                           # activation fake-quant
        a_q = jnp.clip(jnp.round(acc * a_inv) + a_zp, 0.0, q_max)
        acc = (a_q - a_zp) * a_delta

    o_ref[0] = acc.astype(o_ref.dtype)


# ------------------------------ host helpers -------------------------------

def _pick_vmem_limit_bytes():
    """~85% of physical VMEM (headroom for compiler scratch / semaphores / double buffers)."""
    try:
        cap = int(pltpu.get_tpu_info().vmem_capacity_bytes)
        return min(int(cap * 0.85), cap - (8 << 20))   # ~54 MiB on v7x, ~108 MiB on v5e/v6e
    except Exception:
        return None                                    # fall back to Mosaic's default scoped limit


def _pick_row_block(H, Wp, Cin, Cpad, K, kh, kw, x_itemsize, out_itemsize, budget_bytes):
    """Largest row block fitting the VMEM budget while keeping >= 2 grid steps along rows."""
    def step_bytes(rb):
        lout = rb * Wp
        win = (rb + kh - 1) * Wp + (kw - 1)
        return (2 * win * Cin * x_itemsize         # double-buffered halo'd input window
                + 2 * lout * Cpad * out_itemsize   # double-buffered output tile
                + 2 * K * Cpad * 4                 # weight (grid-invariant; conservative)
                + lout * K * 4                     # f32 im2col scratch
                + lout * Cpad * 4)                 # f32 accumulator
    cands = [d for d in range(1, H + 1) if H % d == 0 and ((d * Wp) % 8 == 0 or d == H)]
    pref = [d for d in cands if H // d >= 2] or cands   # >= 2 row steps if at all possible
    fit = [d for d in pref if step_bytes(d) <= budget_bytes] or [min(pref)]
    return max(fit)


# ------------------------------ host wrapper -------------------------------

def quant_module_conv_forward(x_nchw, weight, bias,
                              w_delta=1.0, w_zero_point=0.0,
                              a_delta=1.0, a_zero_point=0.0,
                              n_bits=N_BITS,
                              use_weight_quant=True,
                              use_act_quant=True,
                              disable_act_quant=False,
                              row_block=None,
                              mxu_dtype=None):
    """Forward of QuantModule wrapping nn.Conv2d(Cin, Cout, k, stride=1, padding=k//2)."""
    N, Cin, H, W = x_nchw.shape
    Cout, Cin_w, kh, kw = weight.shape
    assert Cin_w == Cin, "groups != 1 not supported"
    assert kh % 2 == 1 and kw % 2 == 1, "even kernel sizes not supported"
    pad_h, pad_w = kh // 2, kw // 2
    Hp, Wp = H + 2 * pad_h, W + 2 * pad_w
    n_levels = 2 ** n_bits
    K = kh * kw * Cin
    Cpad = max(128, ((Cout + 127) // 128) * 128)       # lane-dense output -> unmasked vst
    # TODO(synk): for HBM-write-bound 64-channel layers consider bf16 output instead of padding
    #             f32 all the way to 128 lanes.

    # MXU operand dtype: bf16 operands + f32 accumulation run the v6e/v7x MXU at full rate.
    # Default stays f32 so the fake-quant levels match the f32 PyTorch reference exactly.
    if mxu_dtype is None:
        mxu_dtype = jnp.bfloat16 if x_nchw.dtype == jnp.bfloat16 else jnp.float32
    mxu_dtype = np.dtype(mxu_dtype)

    vmem_limit = _pick_vmem_limit_bytes()
    budget = (vmem_limit or (32 << 20)) // 2
    if row_block is None:
        row_block = _pick_row_block(H, Wp, Cin, Cpad, K, kh, kw,
                                    mxu_dtype.itemsize, x_nchw.dtype.itemsize, budget)
    assert H % row_block == 0
    n_rb = H // row_block
    lout = row_block * Wp
    assert lout % 8 == 0 or n_rb == 1
    win_len = (row_block + kh - 1) * Wp + (kw - 1)

    # ---- cheap XLA layout prep (no kh*kw im2col inflation in HBM) ----
    # TODO(synk): keep NHWC end-to-end in the surrounding model to drop these transposes/pads.
    x_nhwc = jnp.transpose(x_nchw, (0, 2, 3, 1))
    xp = jnp.pad(x_nhwc, ((0, 0), (pad_h, pad_h), (pad_w, pad_w), (0, 0)))
    x_flat = xp.reshape(N, Hp * Wp, Cin).astype(mxu_dtype)
    x_flat = jnp.pad(x_flat, ((0, 0), (0, kw - 1), (0, 0)))      # slack for the width-wrap trick
    # Halo'd row windows: only ~(kh-1)/row_block extra input bytes, but per-step VMEM is bounded
    # (v7x 64 MiB/TC), slice starts are static in-kernel, and the pipeline double-buffers them.
    starts = [r * row_block * Wp for r in range(n_rb)]
    x_win = jnp.stack([x_flat[:, s:s + win_len, :] for s in starts], axis=1)

    # (Cout, Cin, kh, kw) -> (kh*kw*Cin, Cpad) matching the im2col column order; keep the weight
    # in its original dtype in HBM (fake-quant + cast happen in-kernel, once per grid step).
    w_mat = jnp.transpose(weight, (2, 3, 1, 0)).reshape(K, Cout)
    w_mat = jnp.pad(w_mat, ((0, 0), (0, Cpad - Cout)))
    # TODO(synk): single-buffer the grid-invariant weight/bias (pipeline_mode=pl.Buffered(1)) once
    #             that knob is verified on the target jax version; Pallas already skips re-DMA
    #             because their block index never changes.

    if bias is None:
        bias = jnp.zeros((Cout,), jnp.float32)
    b_pad = jnp.pad(bias.astype(jnp.float32), (0, Cpad - Cout)).reshape(1, Cpad)

    # quant scalars (and exact host-side reciprocals) through SMEM.
    q = jnp.array([w_delta, w_zero_point, 1.0 / w_delta,
                   a_delta, a_zero_point, 1.0 / a_delta], jnp.float32)

    apply_act_quant = bool(use_act_quant) and not bool(disable_act_quant)
    kernel = functools.partial(
        _fused_conv_kernel, kh=kh, kw=kw, Wp=Wp, lout=lout, cin=Cin,
        n_levels=n_levels, use_weight_quant=bool(use_weight_quant),
        apply_act_quant=apply_act_quant, mxu_dtype=mxu_dtype)

    out_flat = pl.pallas_call(
        kernel,
        out_shape=jax.ShapeDtypeStruct((N, H * Wp, Cpad), x_nchw.dtype),
        grid=(N, n_rb),
        in_specs=[
            pl.BlockSpec(memory_space=pltpu.MemorySpace.SMEM),               # quant scalars
            pl.BlockSpec((1, 1, win_len, Cin), lambda n, r: (n, r, 0, 0)),   # halo'd row window
            pl.BlockSpec((K, Cpad), lambda n, r: (0, 0)),                    # weight (invariant)
            pl.BlockSpec((1, Cpad), lambda n, r: (0, 0)),                    # bias   (invariant)
        ],
        out_specs=pl.BlockSpec((1, lout, Cpad), lambda n, r: (n, r, 0)),
        scratch_shapes=[pltpu.VMEM((lout, K), jnp.float32)],                 # micro-im2col
        compiler_params=pltpu.CompilerParams(
            dimension_semantics=("parallel", "parallel"),
            vmem_limit_bytes=vmem_limit),
    )(q, x_win, w_mat, b_pad)

    # Drop width-wrap garbage columns and Cout padding; back to NCHW.
    out = out_flat.reshape(N, H, Wp, Cpad)[:, :, :W, :Cout]
    return jnp.transpose(out, (0, 3, 1, 2))


# ------------------------------ reference ----------------------------------

def reference_forward(x, weight, bias, use_weight_quant, use_act_quant, disable_act_quant,
                      delta=1.0, zero_point=0.0, n_bits=N_BITS):
    n_levels = 2 ** n_bits

    def fq(v):
        v_int = jnp.round(v / delta) + zero_point
        v_q = jnp.clip(v_int, 0.0, float(n_levels - 1))
        return (v_q - zero_point) * delta

    w = fq(weight) if use_weight_quant else weight
    kh, kw = weight.shape[2], weight.shape[3]
    out = jax.lax.conv_general_dilated(
        x, w, window_strides=(1, 1),
        padding=((kh // 2, kh // 2), (kw // 2, kw // 2)),
        dimension_numbers=('NCHW', 'OIHW', 'NCHW'))
    out = out + bias.reshape(1, -1, 1, 1)
    if use_act_quant and not disable_act_quant:
        out = fq(out)
    return out


if __name__ == "__main__":
    key = jax.random.PRNGKey(0)
    k_x, k_w, k_b = jax.random.split(key, 3)

    # org_module = nn.Conv2d(4, 8, kernel_size=3, stride=1, padding=1, bias=True)
    N, Cin, H, W = 2, 4, 16, 16
    Cout, kh, kwid = 8, 3, 3

    x = jax.random.normal(k_x, (N, Cin, H, W), dtype=jnp.float32) * 2.0
    weight = jax.random.normal(k_w, (Cout, Cin, kh, kwid), dtype=jnp.float32) * 1.5
    bias = jax.random.normal(k_b, (Cout,), dtype=jnp.float32)

    # (1) weight fake-quant + conv + bias (no act quant): must match the XLA conv tightly.
    out_nq = quant_module_conv_forward(x, weight, bias, use_weight_quant=True,
                                       use_act_quant=False)
    out_nq = jax.block_until_ready(out_nq)
    ref_nq = jax.block_until_ready(reference_forward(x, weight, bias, True, False, False))
    np.testing.assert_allclose(np.asarray(out_nq), np.asarray(ref_nq), atol=1e-3, rtol=1e-3)

    # (2) full path with activation fake-quant (snaps to integer multiples of a_delta=1.0).
    #     Accumulation-order differences (single K-folded MXU dot vs XLA conv) may flip an exact
    #     .5 rounding boundary by one level on rare elements -> allow at most one level, rarely.
    out = quant_module_conv_forward(x, weight, bias, use_weight_quant=True,
                                    use_act_quant=True, disable_act_quant=False)
    out = jax.block_until_ready(out)
    ref = jax.block_until_ready(reference_forward(x, weight, bias, True, True, False))
    assert out.shape == (N, Cout, H, W), out.shape
    d = np.abs(np.asarray(out) - np.asarray(ref))
    assert d.max() <= 1.0 + 1e-3, d.max()               # never more than one quantization level
    assert (d > 1e-2).mean() <= 2e-3, (d > 1e-2).mean()  # and boundary flips are rare

    # (3) bf16 MXU-operand path (v6e/v7x feedback): still within one activation-quant level.
    out_bf = quant_module_conv_forward(x, weight, bias, mxu_dtype=jnp.bfloat16)
    out_bf = jax.block_until_ready(out_bf)
    d_bf = np.abs(np.asarray(out_bf) - np.asarray(ref))
    assert d_bf.max() <= 1.0 + 1e-2, d_bf.max()

    print("KERNEL_OK")
</pallas_src>

<mosaic_0001>
module attributes {stable_mosaic.version = 11 : i64} {
  func.func @_fused_conv_kernel(%arg0: i32, %arg1: i32, %arg2: memref<6xf32, #tpu.memory_space<smem>>, %arg3: memref<1x1x182x4xf32, #tpu.memory_space<vmem>>, %arg4: memref<36x128xf32, #tpu.memory_space<vmem>>, %arg5: memref<1x128xf32, #tpu.memory_space<vmem>>, %arg6: memref<1x144x128xf32, #tpu.memory_space<vmem>>, %arg7: memref<144x36xf32, #tpu.memory_space<vmem>>) attributes {dimension_semantics = [#tpu.dimension_semantics<parallel>, #tpu.dimension_semantics<parallel>], iteration_bounds = array<i64: 2, 2>, scalar_prefetch = 0 : i64, scratch_operands = 1 : i64, tpu.core_type = #tpu.core_type<tc>, window_params = [{transform_indices = @transform_0, window_bounds = array<i64: 6>}, {transform_indices = @transform_1, window_bounds = array<i64: 1, 1, 182, 4>}, {pipeline_mode = #tpu.pipeline_mode<synchronous>, transform_indices = @transform_2, window_bounds = array<i64: 36, 128>}, {pipeline_mode = #tpu.pipeline_mode<synchronous>, transform_indices = @transform_3, window_bounds = array<i64: 1, 128>}, {transform_indices = @transform_4, window_bounds = array<i64: 1, 144, 128>}]} {
    %c0 = arith.constant 0 : index
    %0 = memref.load %arg2[%c0] : memref<6xf32, #tpu.memory_space<smem>>
    %c1 = arith.constant 1 : index
    %1 = memref.load %arg2[%c1] : memref<6xf32, #tpu.memory_space<smem>>
    %c2 = arith.constant 2 : index
    %2 = memref.load %arg2[%c2] : memref<6xf32, #tpu.memory_space<smem>>
    %c0_0 = arith.constant 0 : index
    %c0_1 = arith.constant 0 : index
    %3 = vector.load %arg4[%c0_0, %c0_1] : memref<36x128xf32, #tpu.memory_space<vmem>>, vector<36x128xf32>
    %4 = vector.broadcast %2 : f32 to vector<36x128xf32>
    %5 = arith.mulf %3, %4 : vector<36x128xf32>
    %6 = math.roundeven %5 : vector<36x128xf32>
    %7 = vector.broadcast %1 : f32 to vector<36x128xf32>
    %8 = arith.addf %6, %7 : vector<36x128xf32>
    %cst = arith.constant 0.000000e+00 : f32
    %cst_2 = arith.constant 2.550000e+02 : f32
    %9 = vector.broadcast %cst : f32 to vector<36x128xf32>
    %10 = arith.maximumf %9, %8 : vector<36x128xf32>
    %11 = vector.broadcast %cst_2 : f32 to vector<36x128xf32>
    %12 = arith.minimumf %11, %10 : vector<36x128xf32>
    %13 = vector.broadcast %1 : f32 to vector<36x128xf32>
    %14 = arith.subf %12, %13 : vector<36x128xf32>
    %15 = vector.broadcast %0 : f32 to vector<36x128xf32>
    %16 = arith.mulf %14, %15 : vector<36x128xf32>
    %c0_3 = arith.constant 0 : index
    %c0_4 = arith.constant 0 : index
    %c0_5 = arith.constant 0 : index
    %c0_6 = arith.constant 0 : index
    %17 = vector.load %arg3[%c0_3, %c0_4, %c0_5, %c0_6] : memref<1x1x182x4xf32, #tpu.memory_space<vmem>>, vector<1x1x182x4xf32>
    %18 = vector.shape_cast %17 : vector<1x1x182x4xf32> to vector<182x4xf32>
    %19 = vector.extract_strided_slice %18 {offsets = [0, 0], sizes = [144, 4], strides = [1, 1]} : vector<182x4xf32> to vector<144x4xf32>
    %c0_7 = arith.constant 0 : index
    %c0_8 = arith.constant 0 : index
    %20 = vector.load %arg7[%c0_7, %c0_8] : memref<144x36xf32, #tpu.memory_space<vmem>>, vector<144x4xf32>
    tpu.vector_store %arg7[%c0_7, %c0_8], %19 {strides = array<i32>} : memref<144x36xf32, #tpu.memory_space<vmem>>, vector<144x4xf32>,
    %21 = vector.extract_strided_slice %18 {offsets = [1, 0], sizes = [144, 4], strides = [1, 1]} : vector<182x4xf32> to vector<144x4xf32>
    %c0_9 = arith.constant 0 : index
    %c4 = arith.constant 4 : index
    %22 = vector.load %arg7[%c0_9, %c4] : memref<144x36xf32, #tpu.memory_space<vmem>>, vector<144x4xf32>
    tpu.vector_store %arg7[%c0_9, %c4], %21 {strides = array<i32>} : memref<144x36xf32, #tpu.memory_space<vmem>>, vector<144x4xf32>,
    %23 = vector.extract_strided_slice %18 {offsets = [2, 0], sizes = [144, 4], strides = [1, 1]} : vector<182x4xf32> to vector<144x4xf32>
    %c0_10 = arith.constant 0 : index
    %c8 = arith.constant 8 : index
    %24 = vector.load %arg7[%c0_10, %c8] : memref<144x36xf32, #tpu.memory_space<vmem>>, vector<144x4xf32>
    tpu.vector_store %arg7[%c0_10, %c8], %23 {strides = array<i32>} : memref<144x36xf32, #tpu.memory_space<vmem>>, vector<144x4xf32>,
    %25 = vector.extract_strided_slice %18 {offsets = [18, 0], sizes = [144, 4], strides = [1, 1]} : vector<182x4xf32> to vector<144x4xf32>
    %c0_11 = arith.constant 0 : index
    %c12 = arith.constant 12 : index
    %26 = vector.load %arg7[%c0_11, %c12] : memref<144x36xf32, #tpu.memory_space<vmem>>, vector<144x4xf32>
    tpu.vector_store %arg7[%c0_11, %c12], %25 {strides = array<i32>} : memref<144x36xf32, #tpu.memory_space<vmem>>, vector<144x4xf32>,
    %27 = vector.extract_strided_slice %18 {offsets = [19, 0], sizes = [144, 4], strides = [1, 1]} : vector<182x4xf32> to vector<144x4xf32>
    %c0_12 = arith.constant 0 : index
    %c16 = arith.constant 16 : index
    %28 = vector.load %arg7[%c0_12, %c16] : memref<144x36xf32, #tpu.memory_space<vmem>>, vector<144x4xf32>
    tpu.vector_store %arg7[%c0_12, %c16], %27 {strides = array<i32>} : memref<144x36xf32, #tpu.memory_space<vmem>>, vector<144x4xf32>,
    %29 = vector.extract_strided_slice %18 {offsets = [20, 0], sizes = [144, 4], strides = [1, 1]} : vector<182x4xf32> to vector<144x4xf32>
    %c0_13 = arith.constant 0 : index
    %c20 = arith.constant 20 : index
    %30 = vector.load %arg7[%c0_13, %c20] : memref<144x36xf32, #tpu.memory_space<vmem>>, vector<144x4xf32>
    tpu.vector_store %arg7[%c0_13, %c20], %29 {strides = array<i32>} : memref<144x36xf32, #tpu.memory_space<vmem>>, vector<144x4xf32>,
    %31 = vector.extract_strided_slice %18 {offsets = [36, 0], sizes = [144, 4], strides = [1, 1]} : vector<182x4xf32> to vector<144x4xf32>
    %c0_14 = arith.constant 0 : index
    %c24 = arith.constant 24 : index
    %32 = vector.load %arg7[%c0_14, %c24] : memref<144x36xf32, #tpu.memory_space<vmem>>, vector<144x4xf32>
    tpu.vector_store %arg7[%c0_14, %c24], %31 {strides = array<i32>} : memref<144x36xf32, #tpu.memory_space<vmem>>, vector<144x4xf32>,
    %33 = vector.extract_strided_slice %18 {offsets = [37, 0], sizes = [144, 4], strides = [1, 1]} : vector<182x4xf32> to vector<144x4xf32>
    %c0_15 = arith.constant 0 : index
    %c28 = arith.constant 28 : index
    %34 = vector.load %arg7[%c0_15, %c28] : memref<144x36xf32, #tpu.memory_space<vmem>>, vector<144x4xf32>
    tpu.vector_store %arg7[%c0_15, %c28], %33 {strides = array<i32>} : memref<144x36xf32, #tpu.memory_space<vmem>>, vector<144x4xf32>,
    %35 = vector.extract_strided_slice %18 {offsets = [38, 0], sizes = [144, 4], strides = [1, 1]} : vector<182x4xf32> to vector<144x4xf32>
    %c0_16 = arith.constant 0 : index
    %c32 = arith.constant 32 : index
    %36 = vector.load %arg7[%c0_16, %c32] : memref<144x36xf32, #tpu.memory_space<vmem>>, vector<144x4xf32>
    tpu.vector_store %arg7[%c0_16, %c32], %35 {strides = array<i32>} : memref<144x36xf32, #tpu.memory_space<vmem>>, vector<144x4xf32>,
    %c0_17 = arith.constant 0 : index
    %c0_18 = arith.constant 0 : index
    %37 = vector.load %arg7[%c0_17, %c0_18] : memref<144x36xf32, #tpu.memory_space<vmem>>, vector<144x36xf32>
    %cst_19 = arith.constant dense<0.000000e+00> : vector<144x128xf32>
    %38 = tpu.matmul %37, %16, %cst_19 {dimension_numbers = #tpu.dot_dimension_numbers<[1], [0], [0], [1], [0, 0, 1, 1], [], []>} : vector<144x36xf32>, vector<36x128xf32>, vector<144x128xf32> -> vector<144x128xf32>
    %c0_20 = arith.constant 0 : index
    %c0_21 = arith.constant 0 : index
    %39 = vector.load %arg5[%c0_20, %c0_21] : memref<1x128xf32, #tpu.memory_space<vmem>>, vector<1x128xf32>
    %40 = vector.broadcast %39 : vector<1x128xf32> to vector<144x128xf32>
    %41 = arith.addf %38, %40 : vector<144x128xf32>
    %c0_22 = arith.constant 0 : index
    %c0_23 = arith.constant 0 : index
    %c0_24 = arith.constant 0 : index
    %42 = vector.load %arg6[%c0_22, %c0_23, %c0_24] : memref<1x144x128xf32, #tpu.memory_space<vmem>>, vector<1x144x128xf32>
    %43 = vector.shape_cast %42 : vector<1x144x128xf32> to vector<144x128xf32>
    %44 = vector.shape_cast %41 : vector<144x128xf32> to vector<1x144x128xf32>
    tpu.vector_store %arg6[%c0_22, %c0_23, %c0_24], %44 {strides = array<i32>} : memref<1x144x128xf32, #tpu.memory_space<vmem>>, vector<1x144x128xf32>,
    return
  }
  func.func @transform_0(%arg0: i32, %arg1: i32) -> i32 {
    %c0_i32 = arith.constant 0 : i32
    %c0_i32_0 = arith.constant 0 : i32
    return %c0_i32 : i32
  }
  func.func @transform_1(%arg0: i32, %arg1: i32) -> (i32, i32, i32, i32) {
    %c0_i32 = arith.constant 0 : i32
    %c0_i32_0 = arith.constant 0 : i32
    %c0_i32_1 = arith.constant 0 : i32
    return %arg0, %arg1, %c0_i32, %c0_i32_0 : i32, i32, i32, i32
  }
  func.func @transform_2(%arg0: i32, %arg1: i32) -> (i32, i32) {
    %c0_i32 = arith.constant 0 : i32
    %c0_i32_0 = arith.constant 0 : i32
    %c0_i32_1 = arith.constant 0 : i32
    return %c0_i32, %c0_i32_0 : i32, i32
  }
  func.func @transform_3(%arg0: i32, %arg1: i32) -> (i32, i32) {
    %c0_i32 = arith.constant 0 : i32
    %c0_i32_0 = arith.constant 0 : i32
    %c0_i32_1 = arith.constant 0 : i32
    return %c0_i32, %c0_i32_0 : i32, i32
  }
  func.func @transform_4(%arg0: i32, %arg1: i32) -> (i32, i32, i32) {
    %c0_i32 = arith.constant 0 : i32
    %c0_i32_0 = arith.constant 0 : i32
    return %arg0, %arg1, %c0_i32 : i32, i32, i32
  }
}

</mosaic_0001>

<bundles_post_ra>
// kernel: tpu_custom_call.1
= control target key start
LH: loop header
LB: loop body
LE: loop exit
PB: predicated region body
PF: predicated region fallthrough
CT: control target
= control target key end

     0   :  { %9 = vsyncpa [#allocation5], 0  ;;  %s2375_s0 = inlined_call_operand.vmem [shape: f32[6], index: 0, kind: input, shape index: {}]   ;;  %s2376_s1 = inlined_call_operand.vmem [shape: f32[2,2,182,4], index: 1, kind: input, shape index: {}]   ;;  %s2377_s2 = inlined_call_operand.vmem [shape: f32[36,128], index: 2, kind: input, shape index: {}]   ;;  %s2378_s3 = inlined_call_operand.vmem [shape: f32[1,128], index: 3, kind: input, shape index: {}]   ;;  %s2379_s4 = inlined_call_operand.hbm [shape: f32[2,288,128], index: 4, kind: output, shape index: {}]  }
   0x1   :  { %10 = vsyncpa [#allocation4], 0 }
   0x2   :  { %12 = vsyncpa [#allocation4 + $0x1], 0  ;;  %s1600_s15 = smov 0   ;;  %s1602_s16 = smov 0  }
   0x3   :  { %s1604_s17 = smov 0   ;;  %s1606_s18 = smov 0  }
   0x4   :  { %s1608_s19 = smov 0   ;;  %s1610_s20 = smov 0  }
   0x5   :  { %s1612_s21 = smov 0   ;;  %s1614_s22 = smov 0  }
   0x6 LB: > { %s1267_s23 = sadd.s32 4294967295, %s1563_s22   ;;  %s1268_s24 = sadd.s32 4294967294, %s1563_s22   ;;  %s1563_s22 = sphi %s1614_s22, %s18_s22   ;;  %s1559_s21 = sphi %s1612_s21, %s2392_s21   ;;  %s1555_s20 = sphi %s1610_s20, %s2391_s20   ;;  %s1551_s19 = sphi %s1608_s19, %s2390_s19   ;;  %s1547_s18 = sphi %s1606_s18, %s2389_s18   ;;  %s1543_s17 = sphi %s1604_s17, %s2388_s17   ;;  %s1539_s16 = sphi %s1602_s16, %s2387_s16   ;;  %s1535_s15 = sphi %s1600_s15, %s2386_s15  }
   0x7   : > { %s27_s25 = sadd.s32 1, %s1555_s20  ;;  %s30_s26 = sadd.s32 1, %s1559_s21 }
   0x8   : > { %p28_p0 = scmp.ge.s32.totalorder %s27_s25, 2  ;;  %s130_s27 = sadd.s32 1, %s1543_s17 }
   0x9   : > { %p140_p1 = scmp.ne.s32.totalorder %s1543_s17, %s1539_s16  ;;  %p141_p2 = scmp.eq.s32.totalorder %s1267_s23, 3 }
   0xa   : > { %s2394_s25 = smov (%p28_p0, %s27_s25), 0  ;;  %s2396_s26 = smov (!%p28_p0, %s30_s26), %s1559_s21 }
   0xb   : > { %s126_s28 = ssub.s32 %s1555_s20, %s2394_s25  ;;  %p1652_p3 = por %p141_p2, %p140_p1 }
   0xc   : > { %p32_p4 = scmp.ge.s32.totalorder %s2396_s26, 2  ;;  %p146_p5 = scmp.ne.s32.totalorder %s1539_s16, %s1535_s15 }
   0xd   : > { %p147_p6 = scmp.eq.s32.totalorder %s1268_s24, 3  ;;  %p1269_p7 = scmp.ge.s32.totalorder %s1563_s22, 1 }
   0xe   : > { %s2398_s26 = smov (%p32_p4, %s2396_s26), 0  ;;  %p154_p9 = scmp.lt.s32.totalorder %s1563_s22, 5 }
   0xf   : > { %p1661_p8 = por %p147_p6, %p146_p5  ;;  %s125_s5 = ssub.s32 %s1559_s21, %s2398_s26 }
  0x10   : > { %s127_s6 = sor.u32 %s126_s28, %s125_s5  ;;  %p155_p10 = pnand %p1269_p7, %p154_p9 }
  0x11   : > { %p128_p11 = scmp.eq.s32.totalorder %s127_s6, 0  ;;  %p1372_p12 = scmp.eq.s32.totalorder %s1267_s23, 0 }
  0x12   : > { %p1364_p13 = pneg %p155_p10  ;;  %s166_s9 = sshll.u32 %s2375_s0, 4  ;;  %s167_s9 = int_to_ptr.vmem [resolvable:$true] %s166_s9 }
  0x13   : > { %s1672_s10 = scalar_select %p128_p11, %s1543_s17, %s130_s27  }
  0x14   : > { %p1365_p0 = pnand %p1372_p12, %p1364_p13  ;;  %s1565_s11 = smov [#allocation3]  }
  0x15   : > { %197 = sbr.rel (%p155_p10) target bundleno = 702 (0x2be), region = 36 }
  0x16   : > { %1367 = dma.vmem_to_smem (!%p1365_p0), %s167_s9, 16, %s1565_s11, [#allocation5]  }
  0x1a   : > { %1526 = dma.done.wait (%p1372_p12), [#allocation5], 16  }
  0x1b   : > { %1528 = vsyncadd (%p1372_p12), [#allocation5], 4294967280 }
  0x1c   : > { %204 = sfence }
  0x1d   : > { %p229_p1 = scmp.lt.s32.totalorder %s1551_s19, 1  ;;  %p231_p2 = scmp.lt.s32.totalorder %s1547_s18, 1  ;;  %vm308_vm0 = vcmask 31744   ;;  %vm405_vm1 = vcmask 64544   ;;  %vm403_vm2 = vcmask 64545   ;;  %vm484_vm3 = vcmask 97344  }
  0x1e   : > { %s1566_s7 = smov 4   ;;  %s1567_s8 = smov 8   ;;  %vm482_vm4 = vcmask 97346   ;;  %vm423_vm5 = vcmask 57376   ;;  %vm563_vm6 = vcmask 130146   ;;  %vm565_vm7 = vcmask 130144  }
  0x1f   : > { %s230_s12 = scalar_select %p229_p1, %s1551_s19, 1  ;;  %vm502_vm8 = vcmask 91200   ;;  %vm583_vm9 = vcmask 124000   ;;  %vm644_vm10 = vcmask 162944   ;;  %vm642_vm11 = vcmask 162947  }
  0x20   : > { %s232_s13 = scalar_select %p231_p2, %s1547_s18, 1  ;;  %vm723_vm12 = vcmask 195744   ;;  %vm721_vm13 = vcmask 195748   ;;  %vm662_vm14 = vcmask 157824  }
  0x21   : > { %s1316_s14 = smul.u32 46, %s230_s12  ;;  %s1568_s9 = smov 12  }
  0x22   : > { %s1315_s23 = smul.u32 23, %s232_s13  ;;  %s1569_s11 = smov 16  }
  0x23   : > { %s1570_s12 = smov 20   ;;  %s1571_s13 = smov 24  }
  0x24   : > { %s235_s24 = sadd.s32 %s1316_s14, %s1315_s23  ;;  %s1572_s14 = smov 28  }
  0x25   : > { %s1274_s27 = sshll.u32 %s235_s24, 3  ;;  %s1573_s23 = smov 32  }
  0x26   : > { %s1681_s6 = scalar_lea.vmem %s2376_s1, %s1274_s27  ;;  %s1276_s24 = sld [smem:[#allocation3 + $0x2]] }
  0x27   : > { %v1684_v0 = vld [vmem:[%s1681_s6 + $0x10] sm:$0xff]  ;;  %v285_v1 = vld [vmem:[%s1681_s6] sm:$0xff]  ;;  %v286_v3 = vld [vmem:[%s1681_s6 + $0x8] sm:$0xff] }
  0x28   : > { %v1688_v2 = vld [vmem:[%s1681_s6 + $0x20] sm:$0xff]  ;;  %350 = vrot.lane.b32.xlu1 %v1684_v0, %s1566_s7  ;;  %346 = vrot.lane.b32.xlu0 %v285_v1, %s1566_s7  ;;  %309 = vst.msk [vmem:[#allocation2] sm:$0xff] %vm308_vm0, %v285_v1  ;;  %v1699_v4 = vld [vmem:[%s1681_s6 + $0x18] sm:$0xff] }
  0x29   : > { %354 = vrot.lane.b32.xlu2 %v1688_v2, %s1566_s7  ;;  %310 = vst.msk [vmem:[#allocation2 + $0x8] sm:$0xff] %vm308_vm0, %v286_v3  ;;  %v1708_v5 = vld [vmem:[%s1681_s6 + $0x28] sm:$0xff]  ;;  %v1713_v6 = vld [vmem:[%s1681_s6 + $0x38] sm:$0xff]  ;;  %v1718_v7 = vld [vmem:[%s1681_s6 + $0x30] sm:$0xff] }
  0x2a   : > { %311 = vst.msk [vmem:[#allocation2 + $0x10] sm:$0xff] %vm308_vm0, %v1684_v0  ;;  %v1723_v8 = vld [vmem:[%s1681_s6 + $0x40] sm:$0xff]  ;;  %v1731_v9 = vld [vmem:[%s1681_s6 + $0x50] sm:$0xff]  ;;  %v1738_v10 = vld [vmem:[%s1681_s6 + $0x48] sm:$0xff] }
  0x2b   : > { %312 = vst.msk [vmem:[#allocation2 + $0x18] sm:$0xff] %vm308_vm0, %v1699_v4  ;;  %v1743_v11 = vld [vmem:[%s1681_s6 + $0x58] sm:$0xff]  ;;  %v1748_v12 = vld [vmem:[%s1681_s6 + $0x68] sm:$0xff]  ;;  %v1753_v13 = vld [vmem:[%s1681_s6 + $0x60] sm:$0xff] }
  0x2c   : > { %313 = vst.msk [vmem:[#allocation2 + $0x20] sm:$0xff] %vm308_vm0, %v1688_v2  ;;  %v1758_v14 = vld [vmem:[%s1681_s6 + $0x70] sm:$0xff]  ;;  %v1763_v15 = vld [vmem:[%s1681_s6 + $0x80] sm:$0xff]  ;;  %v1768_v16 = vld [vmem:[%s1681_s6 + $0x78] sm:$0xff] }
  0x2d   : > { %314 = vst.msk [vmem:[#allocation2 + $0x28] sm:$0xff] %vm308_vm0, %v1708_v5  ;;  %v1777_v17 = vld [vmem:[%s1681_s6 + $0x88] sm:$0xff]  ;;  %v1802_v18 = vld [vmem:[%s1681_s6 + $0x90] sm:$0xff]  ;;  %v1889_v34 = vld [vmem:[%s1681_s6 + $0x98] sm:$0xff] }
  0x2e   : > { %316 = vst.msk [vmem:[#allocation2 + $0x38] sm:$0xff] %vm308_vm0, %v1713_v6  ;;  %v1892_v35 = vld [vmem:[%s1681_s6 + $0xa0] sm:$0xff] }
  0x2f   : > { %315 = vst.msk [vmem:[#allocation2 + $0x30] sm:$0xff] %vm308_vm0, %v1718_v7 }
  0x30   : > { %352 = vrot.lane.b32.xlu1 %v1699_v4, %s1566_s7  ;;  %348 = vrot.lane.b32.xlu0 %v286_v3, %s1566_s7  ;;  %317 = vst.msk [vmem:[#allocation2 + $0x40] sm:$0xff] %vm308_vm0, %v1723_v8 }
  0x31   : > { %356 = vrot.lane.b32.xlu2 %v1708_v5, %s1566_s7  ;;  %319 = vst.msk [vmem:[#allocation2 + $0x50] sm:$0xff] %vm308_vm0, %v1731_v9 }
  0x32   : > { %318 = vst.msk [vmem:[#allocation2 + $0x48] sm:$0xff] %vm308_vm0, %v1738_v10 }
  0x33   : > { %320 = vst.msk [vmem:[#allocation2 + $0x58] sm:$0xff] %vm308_vm0, %v1743_v11 }
  0x34   : > { %322 = vst.msk [vmem:[#allocation2 + $0x68] sm:$0xff] %vm308_vm0, %v1748_v12 }
  0x35   : > { %321 = vst.msk [vmem:[#allocation2 + $0x60] sm:$0xff] %vm308_vm0, %v1753_v13 }
  0x36   : > { %323 = vst.msk [vmem:[#allocation2 + $0x70] sm:$0xff] %vm308_vm0, %v1758_v14 }
  0x37   : > { %325 = vst.msk [vmem:[#allocation2 + $0x80] sm:$0xff] %vm308_vm0, %v1763_v15 }
  0x38   : > { %360 = vrot.lane.b32.xlu1 %v1713_v6, %s1566_s7  ;;  %358 = vrot.lane.b32.xlu0 %v1718_v7, %s1566_s7  ;;  %324 = vst.msk [vmem:[#allocation2 + $0x78] sm:$0xff] %vm308_vm0, %v1768_v16 }
  0x39   : > { %362 = vrot.lane.b32.xlu2 %v1723_v8, %s1566_s7  ;;  %326 = vst.msk [vmem:[#allocation2 + $0x88] sm:$0xff] %vm308_vm0, %v1777_v17 }
  0x40   : > { %366 = vrot.lane.b32.xlu1 %v1731_v9, %s1566_s7  ;;  %364 = vrot.lane.b32.xlu0 %v1738_v10, %s1566_s7 }
  0x41   : > { %368 = vrot.lane.b32.xlu2 %v1743_v11, %s1566_s7 }
  0x48   : > { %372 = vrot.lane.b32.xlu1 %v1748_v12, %s1566_s7  ;;  %370 = vrot.lane.b32.xlu0 %v1753_v13, %s1566_s7 }
  0x49   : > { %374 = vrot.lane.b32.xlu2 %v1758_v14, %s1566_s7 }
  0x50   : > { %378 = vrot.lane.b32.xlu1 %v1763_v15, %s1566_s7  ;;  %376 = vrot.lane.b32.xlu0 %v1768_v16, %s1566_s7 }
  0x51   : > { %380 = vrot.lane.b32.xlu2 %v1777_v17, %s1566_s7 }
  0x58   : > { %425 = vrot.lane.b32.xlu1 %v285_v1, %s1567_s8  ;;  %382 = vrot.lane.b32.xlu0 %v1802_v18, %s1566_s7 }
  0x59   : > { %427 = vrot.lane.b32.xlu2 %v286_v3, %s1567_s8 }
  0x60   : > { %431 = vrot.lane.b32.xlu1 %v1699_v4, %s1567_s8  ;;  %429 = vrot.lane.b32.xlu0 %v1684_v0, %s1567_s8 }
  0x61   : > { %433 = vrot.lane.b32.xlu2 %v1688_v2, %s1567_s8 }
  0x68   : > { %437 = vrot.lane.b32.xlu1 %v1718_v7, %s1567_s8  ;;  %435 = vrot.lane.b32.xlu0 %v1708_v5, %s1567_s8 }
  0x69   : > { %439 = vrot.lane.b32.xlu2 %v1713_v6, %s1567_s8 }
  0x70   : > { %443 = vrot.lane.b32.xlu1 %v1738_v10, %s1567_s8  ;;  %441 = vrot.lane.b32.xlu0 %v1723_v8, %s1567_s8 }
  0x71   : > { %445 = vrot.lane.b32.xlu2 %v1731_v9, %s1567_s8 }
  0x78   : > { %449 = vrot.lane.b32.xlu1 %v1753_v13, %s1567_s8  ;;  %447 = vrot.lane.b32.xlu0 %v1743_v11, %s1567_s8 }
  0x79   : > { %451 = vrot.lane.b32.xlu2 %v1748_v12, %s1567_s8 }
  0x80   : > { %455 = vrot.lane.b32.xlu1 %v1768_v16, %s1567_s8  ;;  %453 = vrot.lane.b32.xlu0 %v1758_v14, %s1567_s8 }
  0x81   : > { %457 = vrot.lane.b32.xlu2 %v1763_v15, %s1567_s8 }
  0x83   : > { %v355_v19 = vpop.permute.xlu2 %354 }
  0x84   : > { %409 = vst.msk [vmem:[#allocation2 + $0x1f] sm:$0xff] %vm405_vm1, %v355_v19 }
  0x88   : > { %461 = vrot.lane.b32.xlu1 %v1802_v18, %s1567_s8  ;;  %459 = vrot.lane.b32.xlu0 %v1777_v17, %s1567_s8 }
  0x89   : > { %506 = vrot.lane.b32.xlu2 %v1684_v0, %s1568_s9 }
  0x8b   : > { %v357_v20 = vpop.permute.xlu2 %356 }
  0x8c   : > { %410 = vst.msk [vmem:[#allocation2 + $0x27] sm:$0xff] %vm405_vm1, %v357_v20 }
  0x90   : > { %510 = vrot.lane.b32.xlu1 %v1688_v2, %s1568_s9  ;;  %508 = vrot.lane.b32.xlu0 %v1699_v4, %s1568_s9 }
  0x91   : > { %512 = vrot.lane.b32.xlu2 %v1708_v5, %s1568_s9 }
  0x93   : > { %v363_v21 = vpop.permute.xlu2 %362 }
  0x94   : > { %413 = vst.msk [vmem:[#allocation2 + $0x3f] sm:$0xff] %vm405_vm1, %v363_v21 }
  0x98   : > { %516 = vrot.lane.b32.xlu1 %v1713_v6, %s1568_s9  ;;  %514 = vrot.lane.b32.xlu0 %v1718_v7, %s1568_s9 }
  0x99   : > { %518 = vrot.lane.b32.xlu2 %v1723_v8, %s1568_s9 }
  0x9a   : > { %v351_v22 = vpop.permute.xlu1 %350  ;;  %v347_v23 = vpop.permute.xlu0 %346 }
  0x9b   : > { %407 = vst.msk [vmem:[#allocation2 + $0xf] sm:$0xff] %vm405_vm1, %v351_v22  ;;  %v369_v24 = vpop.permute.xlu2 %368 }
  0x9c   : > { %404 = vst.msk [vmem:[#allocation2 - $0x1] sm:$0xfe] %vm403_vm2, %v347_v23 }
  0x9d   : > { %416 = vst.msk [vmem:[#allocation2 + $0x57] sm:$0xff] %vm405_vm1, %v369_v24 }
  0xa0   : > { %522 = vrot.lane.b32.xlu1 %v1731_v9, %s1568_s9  ;;  %520 = vrot.lane.b32.xlu0 %v1738_v10, %s1568_s9 }
  0xa1   : > { %524 = vrot.lane.b32.xlu2 %v1743_v11, %s1568_s9 }
  0xa2   : > { %v353_v25 = vpop.permute.xlu1 %352  ;;  %v349_v26 = vpop.permute.xlu0 %348 }
  0xa3   : > { %408 = vst.msk [vmem:[#allocation2 + $0x17] sm:$0xff] %vm405_vm1, %v353_v25  ;;  %v375_v27 = vpop.permute.xlu2 %374 }
  0xa4   : > { %406 = vst.msk [vmem:[#allocation2 + $0x7] sm:$0xff] %vm405_vm1, %v349_v26 }
  0xa5   : > { %419 = vst.msk [vmem:[#allocation2 + $0x6f] sm:$0xff] %vm405_vm1, %v375_v27 }
  0xa8   : > { %528 = vrot.lane.b32.xlu1 %v1748_v12, %s1568_s9  ;;  %526 = vrot.lane.b32.xlu0 %v1753_v13, %s1568_s9 }
  0xa9   : > { %530 = vrot.lane.b32.xlu2 %v1758_v14, %s1568_s9 }
  0xaa   : > { %v361_v28 = vpop.permute.xlu1 %360  ;;  %v359_v29 = vpop.permute.xlu0 %358 }
  0xab   : > { %412 = vst.msk [vmem:[#allocation2 + $0x37] sm:$0xff] %vm405_vm1, %v361_v28  ;;  %v381_v30 = vpop.permute.xlu2 %380 }
  0xac   : > { %411 = vst.msk [vmem:[#allocation2 + $0x2f] sm:$0xff] %vm405_vm1, %v359_v29 }
  0xad   : > { %422 = vst.msk [vmem:[#allocation2 + $0x87] sm:$0xff] %vm405_vm1, %v381_v30 }
  0xb0   : > { %534 = vrot.lane.b32.xlu1 %v1763_v15, %s1568_s9  ;;  %532 = vrot.lane.b32.xlu0 %v1768_v16, %s1568_s9 }
  0xb1   : > { %536 = vrot.lane.b32.xlu2 %v1777_v17, %s1568_s9 }
  0xb2   : > { %v367_v31 = vpop.permute.xlu1 %366  ;;  %v365_v32 = vpop.permute.xlu0 %364 }
  0xb3   : > { %415 = vst.msk [vmem:[#allocation2 + $0x4f] sm:$0xff] %vm405_vm1, %v367_v31  ;;  %v428_v33 = vpop.permute.xlu2 %427 }
  0xb4   : > { %414 = vst.msk [vmem:[#allocation2 + $0x47] sm:$0xff] %vm405_vm1, %v365_v32 }
  0xb5   : > { %485 = vst.msk [vmem:[#allocation2 + $0x6] sm:$0xff] %vm484_vm3, %v428_v33 }
  0xb8   : > { %540 = vrot.lane.b32.xlu1 %v1889_v34, %s1568_s9  ;;  %538 = vrot.lane.b32.xlu0 %v1802_v18, %s1568_s9 }
  0xb9   : > { %542 = vrot.lane.b32.xlu2 %v1892_v35, %s1568_s9  ;;  %s2080_s9 = sld [smem:[#allocation3 + $0x1]] }
  0xba   : > { %v373_v36 = vpop.permute.xlu1 %372  ;;  %v371_v37 = vpop.permute.xlu0 %370 }
  0xbb   : > { %418 = vst.msk [vmem:[#allocation2 + $0x67] sm:$0xff] %vm405_vm1, %v373_v36  ;;  %v434_v38 = vpop.permute.xlu2 %433 }
  0xbc   : > { %417 = vst.msk [vmem:[#allocation2 + $0x5f] sm:$0xff] %vm405_vm1, %v371_v37 }
  0xbd   : > { %488 = vst.msk [vmem:[#allocation2 + $0x1e] sm:$0xff] %vm484_vm3, %v434_v38 }
  0xc0   : > { %587 = vrot.lane.b32.xlu1 %v1699_v4, %s1569_s11  ;;  %585 = vrot.lane.b32.xlu0 %v1684_v0, %s1569_s11 }
  0xc1   : > { %589 = vrot.lane.b32.xlu2 %v1688_v2, %s1569_s11 }
  0xc2   : > { %v379_v39 = vpop.permute.xlu1 %378  ;;  %v377_v40 = vpop.permute.xlu0 %376 }
  0xc3   : > { %421 = vst.msk [vmem:[#allocation2 + $0x7f] sm:$0xff] %vm405_vm1, %v379_v39  ;;  %v440_v41 = vpop.permute.xlu2 %439 }
  0xc4   : > { %420 = vst.msk [vmem:[#allocation2 + $0x77] sm:$0xff] %vm405_vm1, %v377_v40 }
  0xc5   : > { %491 = vst.msk [vmem:[#allocation2 + $0x36] sm:$0xff] %vm484_vm3, %v440_v41 }
  0xc8   : > { %593 = vrot.lane.b32.xlu1 %v1718_v7, %s1569_s11  ;;  %591 = vrot.lane.b32.xlu0 %v1708_v5, %s1569_s11 }
  0xc9   : > { %595 = vrot.lane.b32.xlu2 %v1713_v6, %s1569_s11 }
  0xca   : > { %v426_v42 = vpop.permute.xlu1 %425  ;;  %v383_v43 = vpop.permute.xlu0 %382 }
  0xcb   : > { %483 = vst.msk [vmem:[#allocation2 - $0x2] sm:$0xfc] %vm482_vm4, %v426_v42  ;;  %v446_v44 = vpop.permute.xlu2 %445  ;;  %vm1059_vm4 = vcmask 1043456  }
  0xcc   : > { %424 = vst.msk [vmem:[#allocation2 + $0x8f] sm:$0x1] %vm423_vm5, %v383_v43  ;;  %vm804_vm5 = vcmask 228544  }
  0xcd   : > { %494 = vst.msk [vmem:[#allocation2 + $0x4e] sm:$0xff] %vm484_vm3, %v446_v44 }
  0xd0   : > { %599 = vrot.lane.b32.xlu1 %v1738_v10, %s1569_s11  ;;  %597 = vrot.lane.b32.xlu0 %v1723_v8, %s1569_s11 }
  0xd1   : > { %601 = vrot.lane.b32.xlu2 %v1731_v9, %s1569_s11 }
  0xd2   : > { %v432_v45 = vpop.permute.xlu1 %431  ;;  %v430_v46 = vpop.permute.xlu0 %429 }
  0xd3   : > { %487 = vst.msk [vmem:[#allocation2 + $0x16] sm:$0xff] %vm484_vm3, %v432_v45  ;;  %v452_v47 = vpop.permute.xlu2 %451 }
  0xd4   : > { %486 = vst.msk [vmem:[#allocation2 + $0xe] sm:$0xff] %vm484_vm3, %v430_v46 }
  0xd5   : > { %497 = vst.msk [vmem:[#allocation2 + $0x66] sm:$0xff] %vm484_vm3, %v452_v47  ;;  %v246_v47 = vld [vmem:[%s2377_s2 + $0x20] sm:$0xf] }
  0xd8   : > { %605 = vrot.lane.b32.xlu1 %v1753_v13, %s1569_s11  ;;  %603 = vrot.lane.b32.xlu0 %v1743_v11, %s1569_s11 }
  0xd9   : > { %607 = vrot.lane.b32.xlu2 %v1748_v12, %s1569_s11 }
  0xda   : > { %v438_v48 = vpop.permute.xlu1 %437  ;;  %v436_v49 = vpop.permute.xlu0 %435 }
  0xdb   : > { %490 = vst.msk [vmem:[#allocation2 + $0x2e] sm:$0xff] %vm484_vm3, %v438_v48  ;;  %v458_v50 = vpop.permute.xlu2 %457  ;;  %v247_v48 = vstv %s1276_s24  ;;  %s1357_s24 = smul.u32 36, %s1551_s19 }
  0xdc   : > { %489 = vst.msk [vmem:[#allocation2 + $0x26] sm:$0xff] %vm484_vm3, %v436_v49  ;;  %v245_v49 = vld [vmem:[%s2377_s2 + $0x18] sm:$0xff] }
  0xdd   : > { %500 = vst.msk [vmem:[#allocation2 + $0x7e] sm:$0xff] %vm484_vm3, %v458_v50 }
  0xe0   : > { %611 = vrot.lane.b32.xlu1 %v1768_v16, %s1569_s11  ;;  %609 = vrot.lane.b32.xlu0 %v1758_v14, %s1569_s11 }
  0xe1   : > { %613 = vrot.lane.b32.xlu2 %v1763_v15, %s1569_s11 }
  0xe2   : > { %v444_v51 = vpop.permute.xlu1 %443  ;;  %v442_v52 = vpop.permute.xlu0 %441 }
  0xe3   : > { %493 = vst.msk [vmem:[#allocation2 + $0x46] sm:$0xff] %vm484_vm3, %v444_v51  ;;  %v507_v53 = vpop.permute.xlu2 %506 }
  0xe4   : > { %492 = vst.msk [vmem:[#allocation2 + $0x3e] sm:$0xff] %vm484_vm3, %v442_v52 }
  0xe5   : > { %564 = vst.msk [vmem:[#allocation2 - $0x2] sm:$0xfc] %vm563_vm6, %v507_v53  ;;  %v251_v53 = vmul.f32 %v247_v48, %v245_v49  ;;  %vm883_vm6 = vcmask 261344  }
  0xe8   : > { %617 = vrot.lane.b32.xlu1 %v1802_v18, %s1569_s11  ;;  %615 = vrot.lane.b32.xlu0 %v1777_v17, %s1569_s11 }
  0xe9   : > { %619 = vrot.lane.b32.xlu2 %v1889_v34, %s1569_s11 }
  0xea   : > { %v450_v54 = vpop.permute.xlu1 %449  ;;  %v448_v55 = vpop.permute.xlu0 %447 }
  0xeb   : > { %496 = vst.msk [vmem:[#allocation2 + $0x5e] sm:$0xff] %vm484_vm3, %v450_v54  ;;  %v513_v56 = vpop.permute.xlu2 %512 }
  0xec   : > { %495 = vst.msk [vmem:[#allocation2 + $0x56] sm:$0xff] %vm484_vm3, %v448_v55  ;;  %v244_v55 = vld [vmem:[%s2377_s2 + $0x10] sm:$0xff] }
  0xed   : > { %568 = vst.msk [vmem:[#allocation2 + $0x16] sm:$0xff] %vm565_vm7, %v513_v56 }
  0xf0   : > { %664 = vrot.lane.b32.xlu1 %v1684_v0, %s1570_s12  ;;  %621 = vrot.lane.b32.xlu0 %v1892_v35, %s1569_s11  ;;  %s2103_s11 = sld [smem:[#allocation3]] }
  0xf1   : > { %666 = vrot.lane.b32.xlu2 %v1699_v4, %s1570_s12 }
  0xf2   : > { %v456_v57 = vpop.permute.xlu1 %455  ;;  %v454_v58 = vpop.permute.xlu0 %453 }
  0xf3   : > { %499 = vst.msk [vmem:[#allocation2 + $0x76] sm:$0xff] %vm484_vm3, %v456_v57  ;;  %v519_v59 = vpop.permute.xlu2 %518  ;;  %v1343_v57 = vcvt.f32.s32 %v251_v53 }
  0xf4   : > { %498 = vst.msk [vmem:[#allocation2 + $0x6e] sm:$0xff] %vm484_vm3, %v454_v58  ;;  %v250_v58 = vmul.f32 %v247_v48, %v244_v55 }
  0xf5   : > { %571 = vst.msk [vmem:[#allocation2 + $0x2e] sm:$0xff] %vm565_vm7, %v519_v59  ;;  %v243_v59 = vld [vmem:[%s2377_s2 + $0x8] sm:$0xff] }
  0xf8   : > { %670 = vrot.lane.b32.xlu1 %v1708_v5, %s1570_s12  ;;  %668 = vrot.lane.b32.xlu0 %v1688_v2, %s1570_s12 }
  0xf9   : > { %678 = vrot.lane.b32.xlu2 %v1738_v10, %s1570_s12 }
  0xfa   : > { %v462_v60 = vpop.permute.xlu1 %461  ;;  %v460_v61 = vpop.permute.xlu0 %459 }
  0xfb   : > { %503 = vst.msk [vmem:[#allocation2 + $0x8e] sm:$0x3] %vm502_vm8, %v462_v60  ;;  %v525_v62 = vpop.permute.xlu2 %524  ;;  %vm1004_vm8 = vcmask 293888  }
  0xfc   : > { %501 = vst.msk [vmem:[#allocation2 + $0x86] sm:$0xff] %vm484_vm3, %v460_v61 }
  0xfd   : > { %574 = vst.msk [vmem:[#allocation2 + $0x46] sm:$0xff] %vm565_vm7, %v525_v62  ;;  %v1344_v62 = vcvt.s32.f32 %v1343_v57 }
 0x100   : > { %682 = vrot.lane.b32.xlu1 %v1743_v11, %s1570_s12  ;;  %680 = vrot.lane.b32.xlu0 %v1731_v9, %s1570_s12 }
 0x101   : > { %684 = vrot.lane.b32.xlu2 %v1753_v13, %s1570_s12 }
 0x102   : > { %v511_v63 = vpop.permute.xlu1 %510  ;;  %v509_v0 = vpop.permute.xlu0 %508 }
 0x103   : > { %567 = vst.msk [vmem:[#allocation2 + $0xe] sm:$0xff] %vm565_vm7, %v511_v63  ;;  %v531_v1 = vpop.permute.xlu2 %530  ;;  %v1335_v63 = vcvt.f32.s32 %v250_v58 }
 0x104   : > { %566 = vst.msk [vmem:[#allocation2 + $0x6] sm:$0xff] %vm565_vm7, %v509_v0 }
 0x105   : > { %577 = vst.msk [vmem:[#allocation2 + $0x5e] sm:$0xff] %vm565_vm7, %v531_v1  ;;  %v2091_v1 = vmul.f32 %v247_v48, %v243_v59 }
 0x108   : > { %761 = vrot.lane.b32.xlu1 %v1753_v13, %s1571_s13  ;;  %759 = vrot.lane.b32.xlu0 %v1743_v11, %s1571_s13 }
 0x109   : > { %763 = vrot.lane.b32.xlu2 %v1748_v12, %s1571_s13 }
 0x10a   : > { %v517_v3 = vpop.permute.xlu1 %516  ;;  %v515_v4 = vpop.permute.xlu0 %514 }
 0x10b   : > { %570 = vst.msk [vmem:[#allocation2 + $0x26] sm:$0xff] %vm565_vm7, %v517_v3  ;;  %v537_v19 = vpop.permute.xlu2 %536  ;;  %v242_v3 = vld [vmem:[%s2377_s2] sm:$0xff] }
 0x10c   : > { %569 = vst.msk [vmem:[#allocation2 + $0x1e] sm:$0xff] %vm565_vm7, %v515_v4 }
 0x10d   : > { %580 = vst.msk [vmem:[#allocation2 + $0x76] sm:$0xff] %vm565_vm7, %v537_v19  ;;  %v1345_v19 = vand.u32 2147483647, %v1344_v62 }
 0x110   : > { %840 = vrot.lane.b32.xlu1 %v1753_v13, %s1572_s14  ;;  %765 = vrot.lane.b32.xlu0 %v1758_v14, %s1571_s13 }
 0x111   : > { %842 = vrot.lane.b32.xlu2 %v1748_v12, %s1572_s14 }
 0x112   : > { %v523_v20 = vpop.permute.xlu1 %522  ;;  %v521_v21 = vpop.permute.xlu0 %520 }
 0x113   : > { %573 = vst.msk [vmem:[#allocation2 + $0x3e] sm:$0xff] %vm565_vm7, %v523_v20  ;;  %v543_v22 = vpop.permute.xlu2 %542  ;;  %v1346_v20 = vand.u32 2147483648, %v251_v53 }
 0x114   : > { %572 = vst.msk [vmem:[#allocation2 + $0x36] sm:$0xff] %vm565_vm7, %v521_v21  ;;  %v1336_v21 = vcvt.s32.f32 %v1335_v63 }
 0x115   : > { %584 = vst.msk [vmem:[#allocation2 + $0x8e] sm:$0x3] %vm583_vm9, %v543_v22  ;;  %v1341_v22 = vand.u32 2147483647, %v251_v53  ;;  %vm802_vm9 = vcmask 228548  }
 0x117   : > { %vm1342_vm0 = vcmp.lt.f32.partialorder %v1341_v22, 8388608.0 }
 0x118   : > { %921 = vrot.lane.b32.xlu1 %v1748_v12, %s1573_s23  ;;  %844 = vrot.lane.b32.xlu0 %v1758_v14, %s1572_s14 }
 0x119   : > { %923 = vrot.lane.b32.xlu2 %v1758_v14, %s1573_s23 }
 0x11a   : > { %v529_v23 = vpop.permute.xlu1 %528  ;;  %v527_v24 = vpop.permute.xlu0 %526 }
 0x11b   : > { %576 = vst.msk [vmem:[#allocation2 + $0x56] sm:$0xff] %vm565_vm7, %v529_v23  ;;  %v590_v25 = vpop.permute.xlu2 %589  ;;  %v1327_v23 = vcvt.f32.s32 %v2091_v1 }
 0x11c   : > { %575 = vst.msk [vmem:[#allocation2 + $0x4e] sm:$0xff] %vm565_vm7, %v527_v24  ;;  %v248_v24 = vmul.f32 %v247_v48, %v242_v3 }
 0x11d   : > { %646 = vst.msk [vmem:[#allocation2 + $0xd] sm:$0xff] %vm644_vm10, %v590_v25 }
 0x120   : > { %674 = vrot.lane.b32.xlu1 %v1713_v6, %s1570_s12  ;;  %672 = vrot.lane.b32.xlu0 %v1718_v7, %s1570_s12 }
 0x121   : > { %749 = vrot.lane.b32.xlu2 %v1718_v7, %s1571_s13 }
 0x122   : > { %v535_v26 = vpop.permute.xlu1 %534  ;;  %v533_v27 = vpop.permute.xlu0 %532 }
 0x123   : > { %579 = vst.msk [vmem:[#allocation2 + $0x6e] sm:$0xff] %vm565_vm7, %v535_v26  ;;  %v596_v28 = vpop.permute.xlu2 %595 }
 0x124   : > { %578 = vst.msk [vmem:[#allocation2 + $0x66] sm:$0xff] %vm565_vm7, %v533_v27  ;;  %v2106_v27 = vstv %s2080_s9  ;;  %s1160_s9 = smul.u32 18, %s1547_s18 }
 0x125   : > { %649 = vst.msk [vmem:[#allocation2 + $0x25] sm:$0xff] %vm644_vm10, %v596_v28  ;;  %v1347_v28 = vor.u32 %v1346_v20, %v1345_v19 }
 0x126   : > { %s1164_s27 = sadd.s32 %s1357_s24, %s1160_s9 }
 0x127   : > { %s1296_s18 = sshll.u32 %s1164_s27, 3  ;;  %s1485_s27 = scalar_lea.hbm %s2379_s4, 576 }
 0x128   : > { %753 = vrot.lane.b32.xlu1 %v1723_v8, %s1571_s13  ;;  %751 = vrot.lane.b32.xlu0 %v1713_v6, %s1571_s13  ;;  %s1166_s5 = scalar_lea.hbm %s2379_s4, %s1296_s18 }
 0x129   : > { %755 = vrot.lane.b32.xlu2 %v1738_v10, %s1571_s13 }
 0x12a   : > { %v541_v29 = vpop.permute.xlu1 %540  ;;  %v539_v30 = vpop.permute.xlu0 %538 }
 0x12b   : > { %582 = vst.msk [vmem:[#allocation2 + $0x86] sm:$0xff] %vm565_vm7, %v541_v29  ;;  %v602_v31 = vpop.permute.xlu2 %601  ;;  %v1337_v29 = vand.u32 2147483647, %v1336_v21 }
 0x12c   : > { %581 = vst.msk [vmem:[#allocation2 + $0x7e] sm:$0xff] %vm565_vm7, %v539_v30  ;;  %vm962_vm7 = vcmask 294144  }
 0x12d   : > { %652 = vst.msk [vmem:[#allocation2 + $0x3d] sm:$0xff] %vm644_vm10, %v602_v31 }
 0x130   : > { %688 = vrot.lane.b32.xlu1 %v1758_v14, %s1570_s12  ;;  %686 = vrot.lane.b32.xlu0 %v1748_v12, %s1570_s12 }
 0x131   : > { %690 = vrot.lane.b32.xlu2 %v1768_v16, %s1570_s12 }
 0x132   : > { %v588_v32 = vpop.permute.xlu1 %587  ;;  %v586_v33 = vpop.permute.xlu0 %585 }
 0x133   : > { %645 = vst.msk [vmem:[#allocation2 + $0x5] sm:$0xff] %vm644_vm10, %v588_v32  ;;  %v608_v36 = vpop.permute.xlu2 %607  ;;  %v1333_v32 = vand.u32 2147483647, %v250_v58 }
 0x134   : > { %643 = vst.msk [vmem:[#allocation2 - $0x3] sm:$0xf8] %vm642_vm11, %v586_v33  ;;  %v1338_v33 = vand.u32 2147483648, %v250_v58  ;;  %vm960_vm11 = vcmask 294150  }
 0x135   : > { %655 = vst.msk [vmem:[#allocation2 + $0x55] sm:$0xff] %vm644_vm10, %v608_v36  ;;  %v1348_v36 = vsel %vm1342_vm0, %v1347_v28, %v251_v53  ;;  %vm1334_vm1 = vcmp.lt.f32.partialorder %v1333_v32, 8388608.0 }
 0x138   : > { %694 = vrot.lane.b32.xlu1 %v1777_v17, %s1570_s12  ;;  %692 = vrot.lane.b32.xlu0 %v1763_v15, %s1570_s12 }
 0x139   : > { %830 = vrot.lane.b32.xlu2 %v1713_v6, %s1572_s14 }
 0x13a   : > { %v594_v12 = vpop.permute.xlu1 %593  ;;  %v592_v14 = vpop.permute.xlu0 %591 }
 0x13b   : > { %648 = vst.msk [vmem:[#allocation2 + $0x1d] sm:$0xff] %vm644_vm10, %v594_v12  ;;  %v614_v37 = vpop.permute.xlu2 %613  ;;  %v1328_v12 = vcvt.s32.f32 %v1327_v23 }
 0x13c   : > { %647 = vst.msk [vmem:[#allocation2 + $0x15] sm:$0xff] %vm644_vm10, %v592_v14  ;;  %v1330_v14 = vand.u32 2147483648, %v2091_v1 }
 0x13d   : > { %658 = vst.msk [vmem:[#allocation2 + $0x6d] sm:$0xff] %vm644_vm10, %v614_v37  ;;  %v1319_v37 = vcvt.f32.s32 %v248_v24 }
 0x140   : > { %834 = vrot.lane.b32.xlu1 %v1738_v10, %s1572_s14  ;;  %832 = vrot.lane.b32.xlu0 %v1723_v8, %s1572_s14 }
 0x141   : > { %767 = vrot.lane.b32.xlu2 %v1768_v16, %s1571_s13 }
 0x142   : > { %v600_v38 = vpop.permute.xlu1 %599  ;;  %v598_v39 = vpop.permute.xlu0 %597 }
 0x143   : > { %651 = vst.msk [vmem:[#allocation2 + $0x35] sm:$0xff] %vm644_vm10, %v600_v38  ;;  %v620_v40 = vpop.permute.xlu2 %619 }
 0x144   : > { %650 = vst.msk [vmem:[#allocation2 + $0x2d] sm:$0xff] %vm644_vm10, %v598_v39  ;;  %v262_v39 = vadd.f32 %v1348_v36, %v2106_v27 }
 0x145   : > { %661 = vst.msk [vmem:[#allocation2 + $0x85] sm:$0xff] %vm644_vm10, %v620_v40  ;;  %v1339_v40 = vor.u32 %v1338_v33, %v1337_v29 }
 0x148   : > { %771 = vrot.lane.b32.xlu1 %v1777_v17, %s1571_s13  ;;  %769 = vrot.lane.b32.xlu0 %v1763_v15, %s1571_s13 }
 0x149   : > { %773 = vrot.lane.b32.xlu2 %v1802_v18, %s1571_s13 }
 0x14a   : > { %v606_v41 = vpop.permute.xlu1 %605  ;;  %v604_v42 = vpop.permute.xlu0 %603 }
 0x14b   : > { %654 = vst.msk [vmem:[#allocation2 + $0x4d] sm:$0xff] %vm644_vm10, %v606_v41  ;;  %v667_v43 = vpop.permute.xlu2 %666  ;;  %v1325_v41 = vand.u32 2147483647, %v2091_v1 }
 0x14c   : > { %653 = vst.msk [vmem:[#allocation2 + $0x45] sm:$0xff] %vm644_vm10, %v604_v42  ;;  %v1329_v42 = vand.u32 2147483647, %v1328_v12 }
 0x14d   : > { %724 = vst.msk [vmem:[#allocation2 + $0x4] sm:$0xff] %vm723_vm12, %v667_v43  ;;  %v1320_v43 = vcvt.s32.f32 %v1319_v37  ;;  %vm2121_vm2 = vcmp.lt.f32.partialorder %v1325_v41, 8388608.0 }
 0x150   : > { %911 = vrot.lane.b32.xlu1 %v1723_v8, %s1573_s23  ;;  %775 = vrot.lane.b32.xlu0 %v1889_v34, %s1571_s13 }
 0x151   : > { %913 = vrot.lane.b32.xlu2 %v1738_v10, %s1573_s23  ;;  %v252_v10 = vmul.f32 %v247_v48, %v246_v47  ;;  %v1340_v47 = vsel %vm1334_vm1, %v1339_v40, %v250_v58  ;;  %v1317_v48 = vand.u32 2147483647, %v248_v24  ;;  %v306_v40 = vld [vmem:[%s1681_s6 + $0xa8] sm:$0xff] }
 0x152   : > { %v612_v44 = vpop.permute.xlu1 %611  ;;  %v610_v45 = vpop.permute.xlu0 %609 }
 0x153   : > { %657 = vst.msk [vmem:[#allocation2 + $0x65] sm:$0xff] %vm644_vm10, %v612_v44  ;;  %v679_v46 = vpop.permute.xlu2 %678  ;;  %v1351_v52 = vcvt.f32.s32 %v252_v10  ;;  %v1354_v61 = vand.u32 2147483648, %v252_v10  ;;  %v1349_v0 = vand.u32 2147483647, %v252_v10  ;;  %v1322_v44 = vand.u32 2147483648, %v248_v24 }
 0x154   : > { %656 = vst.msk [vmem:[#allocation2 + $0x5d] sm:$0xff] %vm644_vm10, %v610_v45  ;;  %vm2128_vm3 = vcmp.lt.f32.partialorder %v1317_v48, 8388608.0 }
 0x155   : > { %730 = vst.msk [vmem:[#allocation2 + $0x34] sm:$0xff] %vm723_vm12, %v679_v46  ;;  %v1352_v56 = vcvt.s32.f32 %v1351_v52  ;;  %vm1350_vm15 = vcmp.lt.f32.partialorder %v1349_v0, 8388608.0  ;;  %v267_v46 = vmax.f32 %v262_v39, 0.0 }
 0x157   : > { %v1353_v60 = vand.u32 2147483647, %v1352_v56  ;;  %v272_v53 = vmin.f32 %v267_v46, 255.0  ;;  %v279_v56 = vstv %s2103_s11  ;;  %v307_v46 = vld [vmem:[%s1681_s6 + $0xb0] sm:$0x3f]  ;;  %s226_s6 = sand.u32 1, %s1539_s16  }
 0x158   : > { %850 = vrot.lane.b32.xlu1 %v1777_v17, %s1572_s14  ;;  %846 = vrot.lane.b32.xlu0 %v1768_v16, %s1572_s14  ;;  %s1169_s11 = sshll.u32 %s1166_s5, 4  ;;  %s1170_s11 = int_to_ptr.hbm [resolvable:$true] %s1169_s11 }
 0x159   : > { %852 = vrot.lane.b32.xlu2 %v1802_v18, %s1572_s14  ;;  %v1355_v4 = vor.u32 %v1354_v61, %v1353_v60  ;;  %v277_v62 = vsub.f32 %v272_v53, %v2106_v27 }
 0x15a   : > { %v618_v50 = vpop.permute.xlu1 %617  ;;  %v616_v51 = vpop.permute.xlu0 %615 }
 0x15b   : > { %660 = vst.msk [vmem:[#allocation2 + $0x7d] sm:$0xff] %vm644_vm10, %v618_v50  ;;  %v685_v54 = vpop.permute.xlu2 %684  ;;  %v1331_v50 = vor.u32 %v1330_v14, %v1329_v42 }
 0x15c   : > { %659 = vst.msk [vmem:[#allocation2 + $0x75] sm:$0xff] %vm644_vm10, %v616_v51  ;;  %v1321_v51 = vand.u32 2147483647, %v1320_v43  ;;  %vm881_vm10 = vcmask 261349  }
 0x15d   : > { %733 = vst.msk [vmem:[#allocation2 + $0x4c] sm:$0xff] %vm723_vm12, %v685_v54  ;;  %v1332_v58 = vsel %vm2121_vm2, %v1331_v50, %v2091_v1 }
 0x15e   : > { %v1323_v59 = vor.u32 %v1322_v44, %v1321_v51  ;;  %v260_v63 = vadd.f32 %v1332_v58, %v2106_v27 }
 0x160   : > { %925 = vrot.lane.b32.xlu1 %v1768_v16, %s1573_s23  ;;  %854 = vrot.lane.b32.xlu0 %v1889_v34, %s1572_s14  ;;  %v1356_v16 = vsel %vm1350_vm15, %v1355_v4, %v252_v10  ;;  %v261_v10 = vadd.f32 %v1340_v47, %v2106_v27  ;;  %v1324_v3 = vsel %vm2128_vm3, %v1323_v59, %v248_v24  ;;  %v265_v19 = vmax.f32 %v260_v63, 0.0 }
 0x161   : > { %931 = vrot.lane.b32.xlu2 %v1802_v18, %s1573_s23  ;;  %v263_v31 = vadd.f32 %v1356_v16, %v2106_v27  ;;  %v283_v4 = vmul.f32 %v279_v56, %v277_v62  ;;  %v259_v1 = vadd.f32 %v1324_v3, %v2106_v27  ;;  %vm980_vm15 = vcmask 292096  }
 0x162   : > { %v665_v25 = vpop.permute.xlu1 %664  ;;  %v622_v26 = vpop.permute.xlu0 %621  ;;  %v266_v57 = vmax.f32 %v261_v10, 0.0  ;;  %v270_v21 = vmin.f32 %v265_v19, 255.0 }
 0x163   : > { %722 = vst.msk [vmem:[#allocation2 - $0x4] sm:$0xf0] %vm721_vm13, %v665_v25  ;;  %v2109_v30 = vpop.permute.xlu2 %763  ;;  %v268_v38 = vmax.f32 %v263_v31, 0.0  ;;  %v264_v22 = vmax.f32 %v259_v1, 0.0  ;;  %vm822_vm13 = vcmask 224448  }
 0x164   : > { %663 = vst.msk [vmem:[#allocation2 + $0x8d] sm:$0x7] %vm662_vm14, %v622_v26  ;;  %v271_v0 = vmin.f32 %v266_v57, 255.0  ;;  %v275_v24 = vsub.f32 %v270_v21, %v2106_v27  ;;  %vm901_vm14 = vcmask 258272  }
 0x165   : > { %v273_v45 = vmin.f32 %v268_v38, 255.0  ;;  %v269_v25 = vmin.f32 %v264_v22, 255.0 }
 0x166   : > { %v276_v20 = vsub.f32 %v271_v0, %v2106_v27  ;;  %v281_v29 = vmul.f32 %v279_v56, %v275_v24 }
 0x167   : > { %v278_v52 = vsub.f32 %v273_v45, %v2106_v27  ;;  %v274_v31 = vsub.f32 %v269_v25, %v2106_v27 }
 0x168   : > { %676 = vrot.lane.b32.xlu1 %v1723_v8, %s1570_s12  ;;  %933 = vrot.lane.b32.xlu0 %v1889_v34, %s1573_s23  ;;  %v282_v23 = vmul.f32 %v279_v56, %v276_v20 }
 0x169   : > { %745 = vrot.lane.b32.xlu2 %v1688_v2, %s1571_s13  ;;  %v284_v61 = vmul.f32 %v279_v56, %v278_v52 }
 0x16a   : > { %v671_v8 = vpop.permute.xlu1 %670  ;;  %v669_v55 = vpop.permute.xlu0 %668 }
 0x16b   : > { %726 = vst.msk [vmem:[#allocation2 + $0x14] sm:$0xff] %vm723_vm12, %v671_v8  ;;  %v843_v60 = vpop.permute.xlu2 %842  ;;  %1300 = vmatpush.msk.msra.mxu2 %vm1059_vm4, %v284_v61  ;;  %1299 = vmatpush.msk.msra.mxu1 %vm1059_vm4, %v284_v61 }
 0x16c   : > { %725 = vst.msk [vmem:[#allocation2 + $0xc] sm:$0xff] %vm723_vm12, %v669_v55  ;;  %1301 = vmatpush.msk.msra.mxu3 %vm1059_vm4, %v284_v61  ;;  %1277 = vmatpush.msk.msra.mxu0 %vm1059_vm4, %v284_v61 }
 0x16d   : > { %1303 = vmatpush.msra.mxu2 %v283_v4  ;;  %1302 = vmatpush.msra.mxu1 %v283_v4 }
 0x16e   : > { %1304 = vmatpush.msra.mxu3 %v283_v4  ;;  %1075 = vmatpush.msra.mxu0 %v283_v4 }
 0x16f   : > { %1306 = vmatpush.msra.mxu2 %v282_v23  ;;  %1305 = vmatpush.msra.mxu1 %v282_v23 }
 0x170   : > { %757 = vrot.lane.b32.xlu1 %v1731_v9, %s1571_s13  ;;  %747 = vrot.lane.b32.xlu0 %v1708_v5, %s1571_s13 }
 0x171   : > { %696 = vrot.lane.b32.xlu2 %v1802_v18, %s1570_s12  ;;  %1307 = vmatpush.msra.mxu3 %v282_v23  ;;  %v280_v18 = vmul.f32 %v279_v56, %v274_v31 }
 0x172   : > { %v683_v26 = vpop.permute.xlu1 %682  ;;  %v681_v16 = vpop.permute.xlu0 %680  ;;  %1309 = vmatpush.msra.mxu2 %v281_v29  ;;  %1308 = vmatpush.msra.mxu1 %v281_v29 }
 0x173   : > { %732 = vst.msk [vmem:[#allocation2 + $0x44] sm:$0xff] %vm723_vm12, %v683_v26  ;;  %v924_v28 = vpop.permute.xlu2 %923  ;;  %1310 = vmatpush.msra.mxu3 %v281_v29  ;;  %1076 = vmatpush.msra.mxu0 %v282_v23 }
 0x174   : > { %813 = vst.msk [vmem:[#allocation2 + $0x44] sm:$0xff] %vm804_vm5, %v2109_v30  ;;  %1312 = vmatpush.msra.mxu2 %v280_v18  ;;  %1311 = vmatpush.msra.mxu1 %v280_v18 }
 0x175   : > { %731 = vst.msk [vmem:[#allocation2 + $0x3c] sm:$0xff] %vm723_vm12, %v681_v16  ;;  %1313 = vmatpush.msra.mxu3 %v280_v18  ;;  %1077 = vmatpush.msra.mxu0 %v281_v29 }
 0x177   : > { %1078 = vmatpush.msra.mxu0 %v280_v18 }
 0x178   : > { %826 = vrot.lane.b32.xlu1 %v1708_v5, %s1572_s14  ;;  %824 = vrot.lane.b32.xlu0 %v1688_v2, %s1572_s14 }
 0x179   : > { %836 = vrot.lane.b32.xlu2 %v1731_v9, %s1572_s14 }
 0x17a   : > { %v762_v27 = vpop.permute.xlu1 %761  ;;  %v760_v30 = vpop.permute.xlu0 %759 }
 0x17b   : > { %812 = vst.msk [vmem:[#allocation2 + $0x3c] sm:$0xff] %vm804_vm5, %v762_v27  ;;  %v750_v32 = vpop.permute.xlu2 %749 }
 0x17c   : > { %892 = vst.msk [vmem:[#allocation2 + $0x43] sm:$0xff] %vm883_vm6, %v843_v60 }
 0x17d   : > { %811 = vst.msk [vmem:[#allocation2 + $0x34] sm:$0xff] %vm804_vm5, %v760_v30 }
 0x17e   : > { %806 = vst.msk [vmem:[#allocation2 + $0xc] sm:$0xff] %vm804_vm5, %v750_v32 }
 0x180   : > { %903 = vrot.lane.b32.xlu1 %v1688_v2, %s1573_s23  ;;  %777 = vrot.lane.b32.xlu0 %v1892_v35, %s1571_s13 }
 0x181   : > { %905 = vrot.lane.b32.xlu2 %v1708_v5, %s1573_s23 }
 0x182   : > { %v841_v33 = vpop.permute.xlu1 %840  ;;  %v766_v36 = vpop.permute.xlu0 %765 }
 0x183   : > { %891 = vst.msk [vmem:[#allocation2 + $0x3b] sm:$0xff] %vm883_vm6, %v841_v33  ;;  %v756_v12 = vpop.permute.xlu2 %755 }
 0x184   : > { %814 = vst.msk [vmem:[#allocation2 + $0x4c] sm:$0xff] %vm804_vm5, %v766_v36 }
 0x188   : > { %848 = vrot.lane.b32.xlu1 %v1763_v15, %s1572_s14  ;;  %915 = vrot.lane.b32.xlu0 %v1731_v9, %s1573_s23 }
 0x189   : > { %856 = vrot.lane.b32.xlu2 %v1892_v35, %s1572_s14 }
 0x18a   : > { %v922_v2 = vpop.permute.xlu1 %921  ;;  %v845_v14 = vpop.permute.xlu0 %844 }
 0x18b   : > { %971 = vst.msk [vmem:[#allocation2 + $0x42] sm:$0xff] %vm962_vm7, %v922_v2  ;;  %v691_v5 = vpop.permute.xlu2 %690 }
 0x18c   : > { %893 = vst.msk [vmem:[#allocation2 + $0x4b] sm:$0xff] %vm883_vm6, %v845_v14 }
 0x18d   : > { %972 = vst.msk [vmem:[#allocation2 + $0x4a] sm:$0xff] %vm962_vm7, %v924_v28 }
 0x18e   : > { %736 = vst.msk [vmem:[#allocation2 + $0x64] sm:$0xff] %vm723_vm12, %v691_v5 }
 0x190   : > { %935 = vrot.lane.b32.xlu1 %v1892_v35, %s1573_s23  ;;  %927 = vrot.lane.b32.xlu0 %v1763_v15, %s1573_s23 }
 0x191   : > { %698 = vrot.lane.b32.xlu2 %v1889_v34, %s1570_s12 }
 0x192   : > { %v675_v9 = vpop.permute.xlu1 %674  ;;  %v673_v37 = vpop.permute.xlu0 %672 }
 0x193   : > { %728 = vst.msk [vmem:[#allocation2 + $0x24] sm:$0xff] %vm723_vm12, %v675_v9  ;;  %v831_v38 = vpop.permute.xlu2 %830 }
 0x194   : > { %809 = vst.msk [vmem:[#allocation2 + $0x24] sm:$0xff] %vm804_vm5, %v756_v12  ;;  %v991_v39 = vld [vmem:[#allocation2 + $0x48] sm:$0xff]  ;;  %v2275_v12 = vld [vmem:[%s2378_s3] ss:$0 sm:$0xff] }
 0x195   : > { %727 = vst.msk [vmem:[#allocation2 + $0x1c] sm:$0xff] %vm723_vm12, %v673_v37  ;;  %1287 = vmatmul.msk.f32.vlgmr.msra.gmra.mxu2 %vm1004_vm8, %v991_v39 }
 0x198   : > { %838 = vrot.lane.b32.xlu1 %v1743_v11, %s1572_s14  ;;  %828 = vrot.lane.b32.xlu0 %v1718_v7, %s1572_s14 }
 0x199   : > { %779 = vrot.lane.b32.xlu2 %v306_v40, %s1571_s13 }
 0x19a   : > { %v754_v15 = vpop.permute.xlu1 %753  ;;  %v752_v34 = vpop.permute.xlu0 %751 }
 0x19b   : > { %808 = vst.msk [vmem:[#allocation2 + $0x1c] sm:$0xff] %vm804_vm5, %v754_v15  ;;  %v768_v41 = vpop.permute.xlu2 %767 }
 0x19c   : > { %807 = vst.msk [vmem:[#allocation2 + $0x14] sm:$0xff] %vm804_vm5, %v752_v34 }
 0x19d   : > { %886 = vst.msk [vmem:[#allocation2 + $0x13] sm:$0xff] %vm883_vm6, %v831_v38 }
 0x1a0   : > { %917 = vrot.lane.b32.xlu1 %v1743_v11, %s1573_s23  ;;  %907 = vrot.lane.b32.xlu0 %v1718_v7, %s1573_s23 }
 0x1a1   : > { %858 = vrot.lane.b32.xlu2 %v306_v40, %s1572_s14 }
 0x1a2   : > { %v689_v42 = vpop.permute.xlu1 %688  ;;  %v687_v43 = vpop.permute.xlu0 %686 }
 0x1a3   : > { %735 = vst.msk [vmem:[#allocation2 + $0x5c] sm:$0xff] %vm723_vm12, %v689_v42  ;;  %v774_v44 = vpop.permute.xlu2 %773 }
 0x1a4   : > { %734 = vst.msk [vmem:[#allocation2 + $0x54] sm:$0xff] %vm723_vm12, %v687_v43 }
 0x1a5   : > { %815 = vst.msk [vmem:[#allocation2 + $0x54] sm:$0xff] %vm804_vm5, %v768_v41 }
 0x1a8   : > { %937 = vrot.lane.b32.xlu1 %v306_v40, %s1573_s23  ;;  %929 = vrot.lane.b32.xlu0 %v1777_v17, %s1573_s23 }
 0x1a9   : > { %700 = vrot.lane.b32.xlu2 %v1892_v35, %s1570_s12  ;;  %s1314_s12 = smul.u32 144, %s226_s6 }
 0x1aa   : > { %v695_v7 = vpop.permute.xlu1 %694  ;;  %v693_v11 = vpop.permute.xlu0 %692 }
 0x1ab   : > { %738 = vst.msk [vmem:[#allocation2 + $0x74] sm:$0xff] %vm723_vm12, %v695_v7  ;;  %v914_v45 = vpop.permute.xlu2 %913 }
 0x1ac   : > { %737 = vst.msk [vmem:[#allocation2 + $0x6c] sm:$0xff] %vm723_vm12, %v693_v11 }
 0x1ad   : > { %818 = vst.msk [vmem:[#allocation2 + $0x6c] sm:$0xff] %vm804_vm5, %v774_v44 }
 0x1b0   : > { %909 = vrot.lane.b32.xlu1 %v1713_v6, %s1573_s23  ;;  %781 = vrot.lane.b32.xlu0 %v307_v46, %s1571_s13  ;;  %s1479_s13 = sshra.s32 %s1170_s11, 4  ;;  %s1480_s13 = int_to_ptr.hbm [resolvable:$true] %s1479_s13 }
 0x1b1   : > { %919 = vrot.lane.b32.xlu2 %v1753_v13, %s1573_s23  ;;  %p1486_p7 = scmp.lt.s32.totalorder %s1480_s13, %s2379_s4 }
 0x1b2   : > { %v835_v17 = vpop.permute.xlu1 %834  ;;  %v833_v35 = vpop.permute.xlu0 %832 }
 0x1b3   : > { %888 = vst.msk [vmem:[#allocation2 + $0x23] sm:$0xff] %vm883_vm6, %v835_v17  ;;  %v853_v47 = vpop.permute.xlu2 %852 }
 0x1b4   : > { %887 = vst.msk [vmem:[#allocation2 + $0x1b] sm:$0xff] %vm883_vm6, %v833_v35 }
 0x1b5   : > { %967 = vst.msk [vmem:[#allocation2 + $0x22] sm:$0xff] %vm962_vm7, %v914_v45 }
 0x1b8   : > { %860 = vrot.lane.b32.xlu0 %v307_v46, %s1572_s14  ;;  %939 = vrot.lane.b32.xlu1 %v307_v46, %s1573_s23  ;;  %s2278_s23 = scalar_lea.vmem [#allocation6], %s1314_s12  ;;  %s1153_s12 = scalar_lea.sflag [#allocation4], %s226_s6 }
 0x1b9   : > { %s1167_s7 = sshll.u32 %s2278_s23, 4  ;;  %s1481_s14 = scalar_lea.hbm %s1480_s13, 144  ;;  %s1168_s7 = int_to_ptr.vmem [resolvable:$true] %s1167_s7 }
 0x1ba   : > { %v772_v48 = vpop.permute.xlu1 %771  ;;  %v770_v6 = vpop.permute.xlu0 %769  ;;  %p1482_p4 = scmp.ne.s32.totalorder %s1480_s13, %s1481_s14  ;;  %p1487_p9 = scmp.lt.s32.totalorder %s1485_s27, %s1481_s14 }
 0x1bb   : > { %817 = vst.msk [vmem:[#allocation2 + $0x64] sm:$0xff] %vm804_vm5, %v772_v48  ;;  %v932_v10 = vpop.permute.xlu2 %931 }
 0x1bc   : > { %897 = vst.msk [vmem:[#allocation2 + $0x6b] sm:$0xff] %vm883_vm6, %v853_v47  ;;  %p1483_p5 = pnand %p1482_p4, %p1652_p3  ;;  %p1488_p10 = por %p1487_p9, %p1486_p7 }
 0x1bd   : > { %816 = vst.msk [vmem:[#allocation2 + $0x5c] sm:$0xff] %vm804_vm5, %v770_v6 }
 0x1be   : > { %p1484_p6 = pneg %p1483_p5 }
 0x1c0   : > { %p1489_p11 = pnand %p1488_p10, %p1484_p6 }
 0x1c2   : > { %v912_v13 = vpop.permute.xlu1 %911  ;;  %v776_v49 = vpop.permute.xlu0 %775 }
 0x1c3   : > { %966 = vst.msk [vmem:[#allocation2 + $0x1a] sm:$0xff] %vm962_vm7, %v912_v13  ;;  %v746_v50 = vpop.permute.xlu2 %745 }
 0x1c4   : > { %819 = vst.msk [vmem:[#allocation2 + $0x74] sm:$0xff] %vm804_vm5, %v776_v49 }
 0x1c5   : > { %803 = vst.msk [vmem:[#allocation2 - $0x4] sm:$0xf0] %vm802_vm9, %v746_v50 }
 0x1ca   : > { %v851_v51 = vpop.permute.xlu1 %850  ;;  %v847_v52 = vpop.permute.xlu0 %846  ;;  %v986_v53 = vld [vmem:[#allocation2 + $0x20] sm:$0xff] }
 0x1cb   : > { %896 = vst.msk [vmem:[#allocation2 + $0x63] sm:$0xff] %vm883_vm6, %v851_v51  ;;  %v697_v54 = vpop.permute.xlu2 %696  ;;  %1282 = vmatmul.msk.f32.vlgmr.msra.gmra.mxu1 %vm1004_vm8, %v986_v53 }
 0x1cc   : > { %976 = vst.msk [vmem:[#allocation2 + $0x6a] sm:$0xff] %vm962_vm7, %v932_v10 }
 0x1cd   : > { %894 = vst.msk [vmem:[#allocation2 + $0x53] sm:$0xff] %vm883_vm6, %v847_v52 }
 0x1ce   : > { %739 = vst.msk [vmem:[#allocation2 + $0x7c] sm:$0xff] %vm723_vm12, %v697_v54 }
 0x1d2   : > { %v926_v8 = vpop.permute.xlu1 %925  ;;  %v855_v55 = vpop.permute.xlu0 %854 }
 0x1d3   : > { %973 = vst.msk [vmem:[#allocation2 + $0x52] sm:$0xff] %vm962_vm7, %v926_v8  ;;  %v837_v56 = vpop.permute.xlu2 %836 }
 0x1d4   : > { %898 = vst.msk [vmem:[#allocation2 + $0x73] sm:$0xff] %vm883_vm6, %v855_v55 }
 0x1da   : > { %v677_v57 = vpop.permute.xlu1 %676  ;;  %v934_v58 = vpop.permute.xlu0 %933  ;;  %v992_v59 = vld [vmem:[#allocation2 + $0x50] sm:$0xff] }
 0x1db   : > { %729 = vst.msk [vmem:[#allocation2 + $0x2c] sm:$0xff] %vm723_vm12, %v677_v57  ;;  %v906_v60 = vpop.permute.xlu2 %905  ;;  %1288 = vmatmul.msk.f32.gmra.mxu2 %vm1004_vm8, %v992_v59 }
 0x1dc   : > { %977 = vst.msk [vmem:[#allocation2 + $0x72] sm:$0xff] %vm962_vm7, %v934_v58 }
 0x1e2   : > { %v758_v61 = vpop.permute.xlu1 %757  ;;  %v748_v62 = vpop.permute.xlu0 %747 }
 0x1e3   : > { %810 = vst.msk [vmem:[#allocation2 + $0x2c] sm:$0xff] %vm804_vm5, %v758_v61  ;;  %v857_v63 = vpop.permute.xlu2 %856  ;;  %v996_v0 = vld [vmem:[#allocation2 + $0x70] sm:$0xff] }
 0x1e4   : > { %889 = vst.msk [vmem:[#allocation2 + $0x2b] sm:$0xff] %vm883_vm6, %v837_v56  ;;  %1292 = vmatmul.msk.f32.vlgmr.msra.gmra.mxu3 %vm1004_vm8, %v996_v0 }
 0x1e5   : > { %805 = vst.msk [vmem:[#allocation2 + $0x4] sm:$0xff] %vm804_vm5, %v748_v62 }
 0x1ea   : > { %v827_v3 = vpop.permute.xlu1 %826  ;;  %v825_v4 = vpop.permute.xlu0 %824 }
 0x1eb   : > { %884 = vst.msk [vmem:[#allocation2 + $0x3] sm:$0xff] %vm883_vm6, %v827_v3  ;;  %v699_v19 = vpop.permute.xlu2 %698 }
 0x1ec   : > { %882 = vst.msk [vmem:[#allocation2 - $0x5] sm:$0xe0] %vm881_vm10, %v825_v4 }
 0x1ed   : > { %963 = vst.msk [vmem:[#allocation2 + $0x2] sm:$0xff] %vm962_vm7, %v906_v60 }
 0x1ee   : > { %740 = vst.msk [vmem:[#allocation2 + $0x84] sm:$0xff] %vm723_vm12, %v699_v19  ;;  %vm741_vm12 = vcmask 191648  }
 0x1f2   : > { %v904_v1 = vpop.permute.xlu1 %903  ;;  %v778_v20 = vpop.permute.xlu0 %777 }
 0x1f3   : > { %961 = vst.msk [vmem:[#allocation2 - $0x6] sm:$0xc0] %vm960_vm11, %v904_v1  ;;  %v780_v21 = vpop.permute.xlu2 %779 }
 0x1f4   : > { %820 = vst.msk [vmem:[#allocation2 + $0x7c] sm:$0xff] %vm804_vm5, %v778_v20 }
 0x1f5   : > { %899 = vst.msk [vmem:[#allocation2 + $0x7b] sm:$0xff] %vm883_vm6, %v857_v63 }
 0x1f6   : > { %821 = vst.msk [vmem:[#allocation2 + $0x84] sm:$0xff] %vm804_vm5, %v780_v21 }
 0x1fa   : > { %v849_v22 = vpop.permute.xlu1 %848  ;;  %v916_v23 = vpop.permute.xlu0 %915  ;;  %v982_v24 = vld [vmem:[#allocation2] sm:$0xff] }
 0x1fb   : > { %895 = vst.msk [vmem:[#allocation2 + $0x5b] sm:$0xff] %vm883_vm6, %v849_v22  ;;  %v859_v25 = vpop.permute.xlu2 %858  ;;  %1278 = vmatmul.msk.f32.vlgmr.msra.gmra.mxu0 %vm1004_vm8, %v982_v24 }
 0x1fc   : > { %968 = vst.msk [vmem:[#allocation2 + $0x2a] sm:$0xff] %vm962_vm7, %v916_v23 }
 0x1fd   : > { %900 = vst.msk [vmem:[#allocation2 + $0x83] sm:$0xff] %vm883_vm6, %v859_v25 }
 0x202   : > { %v936_v26 = vpop.permute.xlu1 %935  ;;  %v928_v16 = vpop.permute.xlu0 %927 }
 0x203   : > { %978 = vst.msk [vmem:[#allocation2 + $0x7a] sm:$0xff] %vm962_vm7, %v936_v26  ;;  %v701_v28 = vpop.permute.xlu2 %700  ;;  %v987_v29 = vld [vmem:[#allocation2 + $0x28] sm:$0xff] }
 0x204   : > { %974 = vst.msk [vmem:[#allocation2 + $0x5a] sm:$0xff] %vm962_vm7, %v928_v16  ;;  %1283 = vmatmul.msk.f32.gmra.mxu1 %vm1004_vm8, %v987_v29 }
 0x205   : > { %742 = vst.msk [vmem:[#allocation2 + $0x8c] sm:$0xf] %vm741_vm12, %v701_v28 }
 0x20a   : > { %v839_v31 = vpop.permute.xlu1 %838  ;;  %v829_v18 = vpop.permute.xlu0 %828  ;;  %v997_v27 = vld [vmem:[#allocation2 + $0x78] sm:$0xff] }
 0x20b   : > { %890 = vst.msk [vmem:[#allocation2 + $0x33] sm:$0xff] %vm883_vm6, %v839_v31  ;;  %v920_v30 = vpop.permute.xlu2 %919  ;;  %v993_v32 = vld [vmem:[#allocation2 + $0x58] sm:$0xff]  ;;  %1293 = vmatmul.msk.f32.gmra.mxu3 %vm1004_vm8, %v997_v27 }
 0x20c   : > { %885 = vst.msk [vmem:[#allocation2 + $0xb] sm:$0xff] %vm883_vm6, %v829_v18  ;;  %1289 = vmatmul.msk.f32.gmra.mxu2 %vm1004_vm8, %v993_v32 }
 0x20d   : > { %970 = vst.msk [vmem:[#allocation2 + $0x3a] sm:$0xff] %vm962_vm7, %v920_v30 }
 0x212   : > { %v918_v33 = vpop.permute.xlu1 %917  ;;  %v908_v36 = vpop.permute.xlu0 %907 }
 0x213   : > { %969 = vst.msk [vmem:[#allocation2 + $0x32] sm:$0xff] %vm962_vm7, %v918_v33 }
 0x214   : > { %964 = vst.msk [vmem:[#allocation2 + $0xa] sm:$0xff] %vm962_vm7, %v908_v36  ;;  %v990_v7 = vld [vmem:[#allocation2 + $0x40] sm:$0xff] }
 0x218   : > { %v1107_v2 = vpop.f32.mrf.mxu2 }
 0x219   : > { %v1108_v14 = vadd.f32 %v2275_v12, %v1107_v2 }
 0x21a   : > { %v938_v5 = vpop.permute.xlu1 %937  ;;  %v930_v9 = vpop.permute.xlu0 %929  ;;  %v988_v37 = vld [vmem:[#allocation2 + $0x30] sm:$0xff]  ;;  %v989_v15 = vld [vmem:[#allocation2 + $0x38] sm:$0xff] }
 0x21b   : > { %1143 = vst [vmem:[%s2278_s23 + $0x48] sm:$0xff] %v1108_v14  ;;  %v983_v38 = vld [vmem:[#allocation2 + $0x8] sm:$0xff]  ;;  %1284 = vmatmul.msk.f32.gmra.mxu1 %vm1004_vm8, %v988_v37 }
 0x21c   : > { %979 = vst.msk [vmem:[#allocation2 + $0x82] sm:$0xff] %vm962_vm7, %v938_v5  ;;  %1279 = vmatmul.msk.f32.gmra.mxu0 %vm1004_vm8, %v983_v38 }
 0x21d   : > { %975 = vst.msk [vmem:[#allocation2 + $0x62] sm:$0xff] %vm962_vm7, %v930_v9 }
 0x222   : > { %v910_v39 = vpop.permute.xlu1 %909  ;;  %v782_v40 = vpop.permute.xlu0 %781 }
 0x223   : > { %965 = vst.msk [vmem:[#allocation2 + $0x12] sm:$0xff] %vm962_vm7, %v910_v39  ;;  %1285 = vmatmul.msk.f32.gmra.mxu1 %vm1004_vm8, %v989_v15  ;;  %v998_v34 = vld [vmem:[#allocation2 + $0x80] sm:$0xff] }
 0x224   : > { %823 = vst.msk [vmem:[#allocation2 + $0x8c] sm:$0xf] %vm822_vm13, %v782_v40  ;;  %v994_v41 = vld [vmem:[#allocation2 + $0x60] sm:$0xff]  ;;  %1294 = vmatmul.msk.f32.gmra.mxu3 %vm1004_vm8, %v998_v34  ;;  %v995_v11 = vld [vmem:[#allocation2 + $0x68] sm:$0xff] }
 0x225   : > { %1290 = vmatmul.msk.f32.gmra.mxu2 %vm1004_vm8, %v994_v41 }
 0x22a   : > { %v861_v42 = vpop.permute.xlu0 %860  ;;  %v940_v43 = vpop.permute.xlu1 %939  ;;  %v984_v44 = vld [vmem:[#allocation2 + $0x10] sm:$0xff]  ;;  %v985_v45 = vld [vmem:[#allocation2 + $0x18] sm:$0xff] }
 0x22b   : > { %902 = vst.msk [vmem:[#allocation2 + $0x8b] sm:$0x1f] %vm901_vm14, %v861_v42  ;;  %1280 = vmatmul.msk.f32.gmra.mxu0 %vm1004_vm8, %v984_v44  ;;  %1286 = vmatmul.msk.f32.gmra.mxu1 %vm1004_vm8, %v990_v7 }
 0x22c   : > { %981 = vst.msk [vmem:[#allocation2 + $0x8a] sm:$0x3f] %vm980_vm15, %v940_v43 }
 0x22d   : > { %1291 = vmatmul.msk.f32.gmra.mxu2 %vm1004_vm8, %v995_v11 }
 0x233   : > { %1281 = vmatmul.msk.f32.gmra.mxu0 %vm1004_vm8, %v985_v45  ;;  %v999_v46 = vld [vmem:[#allocation2 + $0x88] sm:$0xff] }
 0x234   : > { %1295 = vmatmul.msk.f32.gmra.mxu3 %vm1004_vm8, %v999_v46 }
 0x248   : > { %v1092_v17 = vpop.f32.mrf.mxu1 }
 0x249   : > { %v1093_v35 = vadd.f32 %v2275_v12, %v1092_v17 }
 0x24b   : > { %1138 = vst [vmem:[%s2278_s23 + $0x20] sm:$0xff] %v1093_v35 }
 0x25e   : > { %v1110_v47 = vpop.f32.mrf.mxu2 }
 0x25f   : > { %v1111_v48 = vadd.f32 %v2275_v12, %v1110_v47 }
 0x261   : > { %1144 = vst [vmem:[%s2278_s23 + $0x50] sm:$0xff] %v1111_v48 }
 0x267   : > { %v1122_v6 = vpop.f32.mrf.mxu3 }
 0x268   : > { %v1123_v10 = vadd.f32 %v2275_v12, %v1122_v6 }
 0x26a   : > { %1148 = vst [vmem:[%s2278_s23 + $0x70] sm:$0xff] %v1123_v10 }
 0x278   : > { %v1080_v13 = vpop.f32.mrf.mxu0 }
 0x279   : > { %v1081_v49 = vadd.f32 %v2275_v12, %v1080_v13 }
 0x27b   : > { %1134 = vst [vmem:[%s2278_s23] sm:$0xff] %v1081_v49 }
 0x281   : > { %v1095_v50 = vpop.f32.mrf.mxu1 }
 0x282   : > { %v1096_v51 = vadd.f32 %v2275_v12, %v1095_v50 }
 0x284   : > { %1139 = vst [vmem:[%s2278_s23 + $0x28] sm:$0xff] %v1096_v51 }
 0x28e   : > { %v1125_v52 = vpop.f32.mrf.mxu3 }
 0x28f   : > { %v1113_v53 = vpop.f32.mrf.mxu2  ;;  %v1126_v54 = vadd.f32 %v2275_v12, %v1125_v52 }
 0x290   : > { %v1114_v8 = vadd.f32 %v2275_v12, %v1113_v53 }
 0x291   : > { %1149 = vst [vmem:[%s2278_s23 + $0x78] sm:$0xff] %v1126_v54 }
 0x292   : > { %1145 = vst [vmem:[%s2278_s23 + $0x58] sm:$0xff] %v1114_v8 }
 0x298   : > { %v1098_v55 = vpop.f32.mrf.mxu1 }
 0x299   : > { %v1083_v56 = vpop.f32.mrf.mxu0  ;;  %v1099_v57 = vadd.f32 %v2275_v12, %v1098_v55 }
 0x29a   : > { %v1084_v58 = vadd.f32 %v2275_v12, %v1083_v56 }
 0x29b   : > { %1140 = vst [vmem:[%s2278_s23 + $0x30] sm:$0xff] %v1099_v57 }
 0x29c   : > { %1135 = vst [vmem:[%s2278_s23 + $0x8] sm:$0xff] %v1084_v58 }
 0x2a0   : > { %v1101_v59 = vpop.f32.mrf.mxu1 }
 0x2a1   : > { %v1102_v60 = vadd.f32 %v2275_v12, %v1101_v59 }
 0x2a3   : > { %1141 = vst [vmem:[%s2278_s23 + $0x38] sm:$0xff] %v1102_v60 }
 0x2a7   : > { %v1128_v61 = vpop.f32.mrf.mxu3 }
 0x2a8   : > { %v1116_v62 = vpop.f32.mrf.mxu2  ;;  %v1129_v63 = vadd.f32 %v2275_v12, %v1128_v61  ;;  %v1086_v0 = vpop.f32.mrf.mxu0 }
 0x2a9   : > { %v1117_v3 = vadd.f32 %v2275_v12, %v1116_v62  ;;  %v1087_v4 = vadd.f32 %v2275_v12, %v1086_v0  ;;  %v1104_v19 = vpop.f32.mrf.mxu1 }
 0x2aa   : > { %1150 = vst [vmem:[%s2278_s23 + $0x80] sm:$0xff] %v1129_v63  ;;  %v1105_v1 = vadd.f32 %v2275_v12, %v1104_v19 }
 0x2ab   : > { %1146 = vst [vmem:[%s2278_s23 + $0x60] sm:$0xff] %v1117_v3 }
 0x2ac   : > { %1136 = vst [vmem:[%s2278_s23 + $0x10] sm:$0xff] %v1087_v4 }
 0x2ad   : > { %1142 = vst [vmem:[%s2278_s23 + $0x40] sm:$0xff] %v1105_v1 }
 0x2b0   : > { %v1119_v20 = vpop.f32.mrf.mxu2  ;;  %v1089_v21 = vpop.f32.mrf.mxu0 }
 0x2b1   : > { %v1120_v22 = vadd.f32 %v2275_v12, %v1119_v20  ;;  %v1090_v23 = vadd.f32 %v2275_v12, %v1089_v21 }
 0x2b3   : > { %1147 = vst [vmem:[%s2278_s23 + $0x68] sm:$0xff] %v1120_v22 }
 0x2b4   : > { %1137 = vst [vmem:[%s2278_s23 + $0x18] sm:$0xff] %v1090_v23 }
 0x2b7   : > { %v1131_v24 = vpop.f32.mrf.mxu3 }
 0x2b8   : > { %v1132_v25 = vadd.f32 %v2275_v12, %v1131_v24 }
 0x2ba   : > { %1151 = vst [vmem:[%s2278_s23 + $0x88] sm:$0xff] %v1132_v25 }
 0x2bb   : > { %1492 = shalt.err (!%p1489_p11)
}
 0x2bc   : > { %s1574_s6 = smov 128  }
 0x2bd   : > { %1362 = dma.vmem_to_hbm [thread:$0]  (%p1652_p3), %s1168_s7, 2304, %s1170_s11, %s1153_s12, %s1574_s6, %s1574_s6, %s1567_s8  }
 0x2be PF: > { %p1374_p12 = scmp.ge.s32.totalorder %s1563_s22, 2  ;;  %s1184_s23 = sand.u32 1, %s1535_s15  }
 0x2bf   : > { %s1185_s28 = scalar_lea.sflag [#allocation4], %s1184_s23 }
 0x2c0   : > { %p1369_p13 = pnand %p1374_p12, %p1661_p8 }
 0x2c2   : > { %p1370_p0 = pneg %p1369_p13 }
 0x2c4   : > { %1530 = dma.done.wait (%p1370_p0), %s1185_s28, 2304  }
 0x2c5   : > { %1532 = vsyncadd (%p1370_p0), %s1185_s28, 4294964992  ;;  %s18_s22 = sadd.s32 1, %s1563_s22   ;;  %s2386_s15 = smov %s1539_s16 }
 0x2c6   : > { %p15_p1 = scmp.ge.s32.totalorder %s18_s22, 6   ;;  %s2387_s16 = smov %s1543_s17 }
 0x2c7   : > { %s2388_s17 = smov %s1672_s10  ;;  %s2389_s18 = smov %s1555_s20 }
 0x2c8   : > { %s2390_s19 = smov %s1559_s21  ;;  %s2391_s20 = smov %s2394_s25 }
 0x2c9   : > { %s2392_s21 = smov %s2398_s26  ;;  %17 = sbr.rel (!%p15_p1) target bundleno = 6 (0x6), region = 76 }
 0x2ce   :  { %1191 = vsyncpa [#allocation4], 1 }
 0x2cf   :  { %1193 = vsyncpa [#allocation4 + $0x1], 1 }
 0x2d0   :  { %1194 = vsyncpa [#allocation5], 1 }
 0x2d1   :  { %1196 = vsyncpa [#allocation5 + $0x1], 1 }

</bundles_post_ra>
